<compile_context>
chip_gen: v5e
topology: v5e:2x2
jax: 0.10.0
libtpu: 0.0.40
codegen_flags: <defaults>
</compile_context>

<pallas_src>
import numpy as np
import jax
import jax.numpy as jnp
from jax.experimental import pallas as pl
from jax.experimental.pallas import tpu as pltpu


OH1, OW1 = 15, 15          # conv1 output spatial
OH2, OW2 = 13, 13          # conv2 output spatial
NPATCH = OH1 * OW1         # 225
KFEAT = 9 * 3 * 3          # 81  (Cin * KH * KW for conv1)
NFLAT = OH2 * OW2          # 169
NCLS = 10


# -----------------------------------------------------------------------------
# Fused kernel: relu -> conv1 -> relu -> conv2 -> relu -> linear -> softmax
# -----------------------------------------------------------------------------
def _final_layer_kernel(p1_ref, w1_ref, b1_ref, s2_ref, b2_ref, wl_ref, bl_ref,
                        o_ref):
    # p1_ref : (TB, 81, 225) f32 VMEM  transposed im2col patches of concat(A,B,C)
    #          axis1 = (Cin, KH, KW) flattened, axis2 = conv1 spatial (y*15+x).
    # w1_ref : (3, 81)        f32 VMEM  conv1 weight, weight.reshape(3, -1)
    # b1_ref : (3, 1)         f32 VMEM  conv1 bias
    # s2_ref : (3, 225, 169)  f32 VMEM  conv2 as dense operator per in-channel
    # b2_ref : (1, 1)         f32 SMEM  conv2 bias
    # wl_ref : (169, 10)      f32 VMEM  linear weight (transposed)
    # bl_ref : (1, 10)        f32 VMEM  linear bias
    # o_ref  : (TB, 10)       f32       softmax probabilities
    tb = p1_ref.shape[0]

    # Hoist weight loads / broadcasts out of the per-sample loop (no per-iter
    # broadcast_in_dim).
    w1 = w1_ref[...]                                      # (3, 81)
    b1 = jnp.broadcast_to(b1_ref[...], (3, NPATCH))       # (3, 225)
    wl = wl_ref[...]                                      # (169, 10)
    bl = bl_ref[...]                                      # (1, 10)
    b2 = b2_ref[0, 0]                                     # scalar from SMEM

    for b in range(tb):                                   # tb <= 8, unrolled
        # ReLU on the input patches (elementwise; commutes with im2col).
        x = jnp.maximum(p1_ref[b], 0.0)                   # (81, 225)

        # conv1: one MXU dot -> (3 channels, 225 spatial), lane-dense output.
        h1 = jnp.dot(w1, x, preferred_element_type=jnp.float32) + b1
        h1 = jnp.maximum(h1, 0.0)                         # (3, 225)

        # conv2 as three (1, 225) @ (225, 169) MXU dots (one per in-channel):
        # no window slicing / lane relayouts; result is already flat (1, 169).
        t2 = jnp.dot(h1[0:1, :], s2_ref[0], preferred_element_type=jnp.float32)
        t2 = t2 + jnp.dot(h1[1:2, :], s2_ref[1], preferred_element_type=jnp.float32)
        t2 = t2 + jnp.dot(h1[2:3, :], s2_ref[2], preferred_element_type=jnp.float32)
        t2 = jnp.maximum(t2 + b2, 0.0)                    # (1, 169)

        # linear 169 -> 10: single MXU dot on the flattened activations.
        logits = jnp.dot(t2, wl, preferred_element_type=jnp.float32) + bl

        # softmax over dim 1 (numerically stable, EUP approx reciprocal).
        m = jnp.max(logits, axis=1, keepdims=True)
        e = jnp.exp(logits - m)
        denom = jnp.sum(e, axis=1, keepdims=True)
        probs = e * pl.reciprocal(denom, approx=True)
        o_ref[pl.ds(b, 1), :] = probs.astype(o_ref.dtype)


# -----------------------------------------------------------------------------
# Wrapper glue: layout plumbing only.
# -----------------------------------------------------------------------------
def _im2col_kt(x):
    """(N, 9, 32, 32) -> (N, 81, 225): patch features (Cin,KH,KW) on axis 1,
    conv1 output spatial (y*15+x) on axis 2 (transposed im2col)."""
    n, c, _, _ = x.shape
    cols = []
    for kh in range(3):
        for kw in range(3):
            cols.append(x[:, :, kh:kh + 2 * OH1:2, kw:kw + 2 * OW1:2])  # (N,9,15,15)
    p = jnp.stack(cols, axis=2)                        # (N, 9, 9, 15, 15)
    return p.reshape(n, c * 9, OH1 * OW1)              # (N, 81, 225)


def _conv2_scatter_indices():
    """Static indices for the conv2-as-dense-operator construction."""
    cc, rr, oo, kk = [], [], [], []
    for c in range(3):
        for i in range(OH2):
            for j in range(OW2):
                for kh in range(3):
                    for kw in range(3):
                        cc.append(c)
                        rr.append((i + kh) * OW1 + (j + kw))
                        oo.append(i * OW2 + j)
                        kk.append(c * 9 + kh * 3 + kw)
    return (np.asarray(cc), np.asarray(rr), np.asarray(oo), np.asarray(kk))


_CC, _RR, _OO, _KK = _conv2_scatter_indices()


def _conv2_operator(w2):
    """(1, 3, 3, 3) conv2 weight -> dense (3, 225, 169) operator with
    S2[c, (i+kh)*15 + (j+kw), i*13 + j] = w2[0, c, kh, kw]."""
    vals = w2.reshape(27)[_KK]
    return jnp.zeros((3, NPATCH, NFLAT), jnp.float32).at[_CC, _RR, _OO].set(vals)


@jax.jit
def _forward_impl(a, b, c, params):
    x = jnp.concatenate([a, b, c], axis=1)             # (N, 9, 32, 32)
    n = x.shape[0]

    # TODO(synk): stride-2 im2col stays wrapper-side (layout plumbing, fused by
    # XLA inside this jit; ~73 KiB per sample).
    p1t = _im2col_kt(x)                                 # (N, 81, 225)

    tb = min(8, n)                                      # batch tile per grid step
    npad = ((n + tb - 1) // tb) * tb
    if npad != n:
        p1t = jnp.pad(p1t, ((0, npad - n), (0, 0), (0, 0)))

    w1v = params["w1"].reshape(3, KFEAT)                # (3, 81)
    b1v = params["b1"].reshape(3, 1)
    s2v = _conv2_operator(params["w2"])                 # (3, 225, 169)
    b2v = params["b2"].reshape(1, 1)
    wlv = params["wl"].reshape(NCLS, NFLAT).T           # (169, 10)
    blv = params["bl"].reshape(1, NCLS)

    flops = 2 * npad * (3 * KFEAT * NPATCH + 3 * NPATCH * NFLAT + NFLAT * NCLS)
    bytes_accessed = 4 * (p1t.size + w1v.size + b1v.size + s2v.size + b2v.size
                          + wlv.size + blv.size + npad * NCLS)

    out = pl.pallas_call(
        _final_layer_kernel,
        out_shape=jax.ShapeDtypeStruct((npad, NCLS), jnp.float32),
        grid=(npad // tb,),
        in_specs=[
            pl.BlockSpec((tb, KFEAT, NPATCH), lambda i: (i, 0, 0)),   # p1t (batched)
            pl.BlockSpec((3, KFEAT), lambda i: (0, 0)),               # w1
            pl.BlockSpec((3, 1), lambda i: (0, 0)),                   # b1
            pl.BlockSpec((3, NPATCH, NFLAT), lambda i: (0, 0, 0)),    # conv2 operator
            pl.BlockSpec(memory_space=pltpu.MemorySpace.SMEM),        # b2 scalar
            pl.BlockSpec((NFLAT, NCLS), lambda i: (0, 0)),            # wl
            pl.BlockSpec((1, NCLS), lambda i: (0, 0)),                # bl
        ],
        out_specs=pl.BlockSpec((tb, NCLS), lambda i: (i, 0)),
        compiler_params=pltpu.CompilerParams(
            # Batch axis is independent -> both TensorCores on v7x.
            dimension_semantics=("parallel",),
            # Explicit scoped-VMEM limit: above v5e's 16 MiB default, far under
            # v7x's 64 MiB physical VMEM (block footprint is ~1 MiB).
            vmem_limit_bytes=32 * 1024 * 1024,
        ),
        cost_estimate=pl.CostEstimate(
            flops=flops,
            transcendentals=npad * (NCLS + 1),
            bytes_accessed=bytes_accessed),
    )(p1t, w1v, b1v, s2v, b2v, wlv, blv)
    return out[:n]


def final_layer_forward(t, params):
    """Mirrors FinalLayer.forward. `t` is a tuple; int entries become zeros."""
    shape = t[0].shape  # (N, 3, H, W)

    def pick(v):
        if isinstance(v, int):                          # Python-level branch
            return jnp.zeros(shape, jnp.float32)
        return v

    return _forward_impl(pick(t[-3]), pick(t[-2]), pick(t[-1]), params)


def init_params(key):
    k1, k2, k3, k4, k5, k6 = jax.random.split(key, 6)
    return {
        "w1": jax.random.normal(k1, (3, 9, 3, 3), jnp.float32) * 0.1,   # conv1
        "b1": jax.random.normal(k2, (3,), jnp.float32) * 0.1,
        "w2": jax.random.normal(k3, (1, 3, 3, 3), jnp.float32) * 0.1,   # conv2
        "b2": jax.random.normal(k4, (1,), jnp.float32) * 0.1,
        "wl": jax.random.normal(k5, (10, 169), jnp.float32) * 0.1,      # linear
        "bl": jax.random.normal(k6, (10,), jnp.float32) * 0.1,
    }


def _reference_forward(a, b, c, params):
    """Pure-JAX reference mirroring the torch module."""
    x = jnp.maximum(jnp.concatenate([a, b, c], axis=1), 0.0)
    y = jax.lax.conv_general_dilated(
        x, params["w1"], (2, 2), "VALID",
        dimension_numbers=("NCHW", "OIHW", "NCHW"))
    y = jnp.maximum(y + params["b1"].reshape(1, 3, 1, 1), 0.0)
    z = jax.lax.conv_general_dilated(
        y, params["w2"], (1, 1), "VALID",
        dimension_numbers=("NCHW", "OIHW", "NCHW"))
    z = jnp.maximum(z + params["b2"].reshape(1, 1, 1, 1), 0.0)
    flat = z.reshape(-1, NFLAT)
    logits = flat @ params["wl"].T + params["bl"]
    return jax.nn.softmax(logits, axis=1)


# -----------------------------------------------------------------------------
# Main
# -----------------------------------------------------------------------------
if __name__ == "__main__":
    key = jax.random.PRNGKey(0)
    pkey, xkey = jax.random.split(key)
    params = init_params(pkey)

    ka, kb, kc = jax.random.split(xkey, 3)
    # Each branch input: (N=2, C=3, H=32, W=32); 32x32 -> 15x15 -> 13x13.
    inA = jax.random.normal(ka, (2, 3, 32, 32), jnp.float32)
    inB = jax.random.normal(kb, (2, 3, 32, 32), jnp.float32)
    inC = jax.random.normal(kc, (2, 3, 32, 32), jnp.float32)

    out = final_layer_forward((inA, inB, inC), params)
    out = jax.block_until_ready(out)

    assert out.shape == (2, 10), out.shape
    assert bool(jnp.all(jnp.isfinite(out)))
    # Approx-reciprocal softmax: row sums are ~1 within EUP rcp accuracy.
    row_sums = jnp.sum(out, axis=1)
    assert bool(jnp.all(jnp.abs(row_sums - 1.0) < 5e-3)), row_sums

    ref = _reference_forward(inA, inB, inC, params)
    assert bool(jnp.allclose(out, ref, rtol=2e-3, atol=2e-3)), (out, ref)

    print("KERNEL_OK")
</pallas_src>

<mosaic_0001>
module attributes {stable_mosaic.version = 11 : i64} {
  func.func @_final_layer_kernel(%arg0: i32, %arg1: memref<2x81x225xf32, #tpu.memory_space<vmem>>, %arg2: memref<3x81xf32, #tpu.memory_space<vmem>>, %arg3: memref<3x1xf32, #tpu.memory_space<vmem>>, %arg4: memref<3x225x169xf32, #tpu.memory_space<vmem>>, %arg5: memref<1x1xf32, #tpu.memory_space<smem>>, %arg6: memref<169x10xf32, #tpu.memory_space<vmem>>, %arg7: memref<1x10xf32, #tpu.memory_space<vmem>>, %arg8: memref<2x10xf32, #tpu.memory_space<vmem>>) attributes {dimension_semantics = [#tpu.dimension_semantics<parallel>], iteration_bounds = array<i64: 1>, scalar_prefetch = 0 : i64, scratch_operands = 0 : i64, tpu.core_type = #tpu.core_type<tc>, window_params = [{transform_indices = @transform_0, window_bounds = array<i64: 2, 81, 225>}, {pipeline_mode = #tpu.pipeline_mode<synchronous>, transform_indices = @transform_1, window_bounds = array<i64: 3, 81>}, {pipeline_mode = #tpu.pipeline_mode<synchronous>, transform_indices = @transform_2, window_bounds = array<i64: 3, 1>}, {pipeline_mode = #tpu.pipeline_mode<synchronous>, transform_indices = @transform_3, window_bounds = array<i64: 3, 225, 169>}, {transform_indices = @transform_4, window_bounds = array<i64: 1, 1>}, {pipeline_mode = #tpu.pipeline_mode<synchronous>, transform_indices = @transform_5, window_bounds = array<i64: 169, 10>}, {pipeline_mode = #tpu.pipeline_mode<synchronous>, transform_indices = @transform_6, window_bounds = array<i64: 1, 10>}, {transform_indices = @transform_7, window_bounds = array<i64: 2, 10>}]} {
    %c0 = arith.constant 0 : index
    %c0_0 = arith.constant 0 : index
    %0 = vector.load %arg2[%c0, %c0_0] : memref<3x81xf32, #tpu.memory_space<vmem>>, vector<3x81xf32>
    %c0_1 = arith.constant 0 : index
    %c0_2 = arith.constant 0 : index
    %1 = vector.load %arg3[%c0_1, %c0_2] : memref<3x1xf32, #tpu.memory_space<vmem>>, vector<3x1xf32>
    %2 = vector.shape_cast %1 : vector<3x1xf32> to vector<3x1xf32>
    %3 = vector.broadcast %2 : vector<3x1xf32> to vector<3x225xf32>
    %c0_3 = arith.constant 0 : index
    %c0_4 = arith.constant 0 : index
    %4 = vector.load %arg6[%c0_3, %c0_4] : memref<169x10xf32, #tpu.memory_space<vmem>>, vector<169x10xf32>
    %c0_5 = arith.constant 0 : index
    %c0_6 = arith.constant 0 : index
    %5 = vector.load %arg7[%c0_5, %c0_6] : memref<1x10xf32, #tpu.memory_space<vmem>>, vector<1x10xf32>
    %c0_7 = arith.constant 0 : index
    %c0_8 = arith.constant 0 : index
    %6 = memref.load %arg5[%c0_7, %c0_8] : memref<1x1xf32, #tpu.memory_space<smem>>
    %c0_9 = arith.constant 0 : index
    %c0_10 = arith.constant 0 : index
    %c0_11 = arith.constant 0 : index
    %7 = vector.load %arg1[%c0_9, %c0_10, %c0_11] : memref<2x81x225xf32, #tpu.memory_space<vmem>>, vector<1x81x225xf32>
    %8 = vector.shape_cast %7 : vector<1x81x225xf32> to vector<81x225xf32>
    %cst = arith.constant 0.000000e+00 : f32
    %9 = vector.broadcast %cst : f32 to vector<81x225xf32>
    %10 = arith.maximumf %8, %9 : vector<81x225xf32>
    %cst_12 = arith.constant dense<0.000000e+00> : vector<3x225xf32>
    %11 = tpu.matmul %0, %10, %cst_12 {dimension_numbers = #tpu.dot_dimension_numbers<[1], [0], [0], [1], [0, 0, 1, 1], [], []>} : vector<3x81xf32>, vector<81x225xf32>, vector<3x225xf32> -> vector<3x225xf32>
    %12 = arith.addf %11, %3 : vector<3x225xf32>
    %cst_13 = arith.constant 0.000000e+00 : f32
    %13 = vector.broadcast %cst_13 : f32 to vector<3x225xf32>
    %14 = arith.maximumf %12, %13 : vector<3x225xf32>
    %15 = vector.extract_strided_slice %14 {offsets = [0, 0], sizes = [1, 225], strides = [1, 1]} : vector<3x225xf32> to vector<1x225xf32>
    %c0_14 = arith.constant 0 : index
    %c0_15 = arith.constant 0 : index
    %c0_16 = arith.constant 0 : index
    %16 = vector.load %arg4[%c0_14, %c0_15, %c0_16] : memref<3x225x169xf32, #tpu.memory_space<vmem>>, vector<1x225x169xf32>
    %17 = vector.shape_cast %16 : vector<1x225x169xf32> to vector<225x169xf32>
    %cst_17 = arith.constant dense<0.000000e+00> : vector<1x169xf32>
    %18 = tpu.matmul %15, %17, %cst_17 {dimension_numbers = #tpu.dot_dimension_numbers<[1], [0], [0], [1], [0, 0, 1, 1], [], []>} : vector<1x225xf32>, vector<225x169xf32>, vector<1x169xf32> -> vector<1x169xf32>
    %19 = vector.extract_strided_slice %14 {offsets = [1, 0], sizes = [1, 225], strides = [1, 1]} : vector<3x225xf32> to vector<1x225xf32>
    %c1 = arith.constant 1 : index
    %c0_18 = arith.constant 0 : index
    %c0_19 = arith.constant 0 : index
    %20 = vector.load %arg4[%c1, %c0_18, %c0_19] : memref<3x225x169xf32, #tpu.memory_space<vmem>>, vector<1x225x169xf32>
    %21 = vector.shape_cast %20 : vector<1x225x169xf32> to vector<225x169xf32>
    %cst_20 = arith.constant dense<0.000000e+00> : vector<1x169xf32>
    %22 = tpu.matmul %19, %21, %cst_20 {dimension_numbers = #tpu.dot_dimension_numbers<[1], [0], [0], [1], [0, 0, 1, 1], [], []>} : vector<1x225xf32>, vector<225x169xf32>, vector<1x169xf32> -> vector<1x169xf32>
    %23 = arith.addf %18, %22 : vector<1x169xf32>
    %24 = vector.extract_strided_slice %14 {offsets = [2, 0], sizes = [1, 225], strides = [1, 1]} : vector<3x225xf32> to vector<1x225xf32>
    %c2 = arith.constant 2 : index
    %c0_21 = arith.constant 0 : index
    %c0_22 = arith.constant 0 : index
    %25 = vector.load %arg4[%c2, %c0_21, %c0_22] : memref<3x225x169xf32, #tpu.memory_space<vmem>>, vector<1x225x169xf32>
    %26 = vector.shape_cast %25 : vector<1x225x169xf32> to vector<225x169xf32>
    %cst_23 = arith.constant dense<0.000000e+00> : vector<1x169xf32>
    %27 = tpu.matmul %24, %26, %cst_23 {dimension_numbers = #tpu.dot_dimension_numbers<[1], [0], [0], [1], [0, 0, 1, 1], [], []>} : vector<1x225xf32>, vector<225x169xf32>, vector<1x169xf32> -> vector<1x169xf32>
    %28 = arith.addf %23, %27 : vector<1x169xf32>
    %29 = vector.broadcast %6 : f32 to vector<1x169xf32>
    %30 = arith.addf %28, %29 : vector<1x169xf32>
    %cst_24 = arith.constant 0.000000e+00 : f32
    %31 = vector.broadcast %cst_24 : f32 to vector<1x169xf32>
    %32 = arith.maximumf %30, %31 : vector<1x169xf32>
    %cst_25 = arith.constant dense<0.000000e+00> : vector<1x10xf32>
    %33 = tpu.matmul %32, %4, %cst_25 {dimension_numbers = #tpu.dot_dimension_numbers<[1], [0], [0], [1], [0, 0, 1, 1], [], []>} : vector<1x169xf32>, vector<169x10xf32>, vector<1x10xf32> -> vector<1x10xf32>
    %34 = arith.addf %33, %5 : vector<1x10xf32>
    %cst_26 = arith.constant dense<0xFF800000> : vector<1xf32>
    %35 = vector.multi_reduction <maximumf>, %34, %cst_26 [1] : vector<1x10xf32> to vector<1xf32>
    %36 = vector.shape_cast %35 : vector<1xf32> to vector<1x1xf32>
    %37 = vector.broadcast %36 : vector<1x1xf32> to vector<1x10xf32>
    %38 = arith.subf %34, %37 : vector<1x10xf32>
    %39 = math.exp %38 : vector<1x10xf32>
    %cst_27 = arith.constant dense<0.000000e+00> : vector<1xf32>
    %40 = vector.multi_reduction <add>, %39, %cst_27 [1] : vector<1x10xf32> to vector<1xf32>
    %41 = vector.shape_cast %40 : vector<1xf32> to vector<1x1xf32>
    %42 = tpu.reciprocal %41 {approx = true} : vector<1x1xf32> -> vector<1x1xf32>
    %43 = vector.broadcast %42 : vector<1x1xf32> to vector<1x10xf32>
    %44 = arith.mulf %39, %43 : vector<1x10xf32>
    %c0_28 = arith.constant 0 : index
    %c0_29 = arith.constant 0 : index
    %45 = vector.load %arg8[%c0_28, %c0_29] : memref<2x10xf32, #tpu.memory_space<vmem>>, vector<1x10xf32>
    tpu.vector_store %arg8[%c0_28, %c0_29], %44 {strides = array<i32>} : memref<2x10xf32, #tpu.memory_space<vmem>>, vector<1x10xf32>,
    %c1_30 = arith.constant 1 : index
    %c0_31 = arith.constant 0 : index
    %c0_32 = arith.constant 0 : index
    %46 = vector.load %arg1[%c1_30, %c0_31, %c0_32] : memref<2x81x225xf32, #tpu.memory_space<vmem>>, vector<1x81x225xf32>
    %47 = vector.shape_cast %46 : vector<1x81x225xf32> to vector<81x225xf32>
    %cst_33 = arith.constant 0.000000e+00 : f32
    %48 = vector.broadcast %cst_33 : f32 to vector<81x225xf32>
    %49 = arith.maximumf %47, %48 : vector<81x225xf32>
    %cst_34 = arith.constant dense<0.000000e+00> : vector<3x225xf32>
    %50 = tpu.matmul %0, %49, %cst_34 {dimension_numbers = #tpu.dot_dimension_numbers<[1], [0], [0], [1], [0, 0, 1, 1], [], []>} : vector<3x81xf32>, vector<81x225xf32>, vector<3x225xf32> -> vector<3x225xf32>
    %51 = arith.addf %50, %3 : vector<3x225xf32>
    %cst_35 = arith.constant 0.000000e+00 : f32
    %52 = vector.broadcast %cst_35 : f32 to vector<3x225xf32>
    %53 = arith.maximumf %51, %52 : vector<3x225xf32>
    %54 = vector.extract_strided_slice %53 {offsets = [0, 0], sizes = [1, 225], strides = [1, 1]} : vector<3x225xf32> to vector<1x225xf32>
    %c0_36 = arith.constant 0 : index
    %c0_37 = arith.constant 0 : index
    %c0_38 = arith.constant 0 : index
    %55 = vector.load %arg4[%c0_36, %c0_37, %c0_38] : memref<3x225x169xf32, #tpu.memory_space<vmem>>, vector<1x225x169xf32>
    %56 = vector.shape_cast %55 : vector<1x225x169xf32> to vector<225x169xf32>
    %cst_39 = arith.constant dense<0.000000e+00> : vector<1x169xf32>
    %57 = tpu.matmul %54, %56, %cst_39 {dimension_numbers = #tpu.dot_dimension_numbers<[1], [0], [0], [1], [0, 0, 1, 1], [], []>} : vector<1x225xf32>, vector<225x169xf32>, vector<1x169xf32> -> vector<1x169xf32>
    %58 = vector.extract_strided_slice %53 {offsets = [1, 0], sizes = [1, 225], strides = [1, 1]} : vector<3x225xf32> to vector<1x225xf32>
    %c1_40 = arith.constant 1 : index
    %c0_41 = arith.constant 0 : index
    %c0_42 = arith.constant 0 : index
    %59 = vector.load %arg4[%c1_40, %c0_41, %c0_42] : memref<3x225x169xf32, #tpu.memory_space<vmem>>, vector<1x225x169xf32>
    %60 = vector.shape_cast %59 : vector<1x225x169xf32> to vector<225x169xf32>
    %cst_43 = arith.constant dense<0.000000e+00> : vector<1x169xf32>
    %61 = tpu.matmul %58, %60, %cst_43 {dimension_numbers = #tpu.dot_dimension_numbers<[1], [0], [0], [1], [0, 0, 1, 1], [], []>} : vector<1x225xf32>, vector<225x169xf32>, vector<1x169xf32> -> vector<1x169xf32>
    %62 = arith.addf %57, %61 : vector<1x169xf32>
    %63 = vector.extract_strided_slice %53 {offsets = [2, 0], sizes = [1, 225], strides = [1, 1]} : vector<3x225xf32> to vector<1x225xf32>
    %c2_44 = arith.constant 2 : index
    %c0_45 = arith.constant 0 : index
    %c0_46 = arith.constant 0 : index
    %64 = vector.load %arg4[%c2_44, %c0_45, %c0_46] : memref<3x225x169xf32, #tpu.memory_space<vmem>>, vector<1x225x169xf32>
    %65 = vector.shape_cast %64 : vector<1x225x169xf32> to vector<225x169xf32>
    %cst_47 = arith.constant dense<0.000000e+00> : vector<1x169xf32>
    %66 = tpu.matmul %63, %65, %cst_47 {dimension_numbers = #tpu.dot_dimension_numbers<[1], [0], [0], [1], [0, 0, 1, 1], [], []>} : vector<1x225xf32>, vector<225x169xf32>, vector<1x169xf32> -> vector<1x169xf32>
    %67 = arith.addf %62, %66 : vector<1x169xf32>
    %68 = vector.broadcast %6 : f32 to vector<1x169xf32>
    %69 = arith.addf %67, %68 : vector<1x169xf32>
    %cst_48 = arith.constant 0.000000e+00 : f32
    %70 = vector.broadcast %cst_48 : f32 to vector<1x169xf32>
    %71 = arith.maximumf %69, %70 : vector<1x169xf32>
    %cst_49 = arith.constant dense<0.000000e+00> : vector<1x10xf32>
    %72 = tpu.matmul %71, %4, %cst_49 {dimension_numbers = #tpu.dot_dimension_numbers<[1], [0], [0], [1], [0, 0, 1, 1], [], []>} : vector<1x169xf32>, vector<169x10xf32>, vector<1x10xf32> -> vector<1x10xf32>
    %73 = arith.addf %72, %5 : vector<1x10xf32>
    %cst_50 = arith.constant dense<0xFF800000> : vector<1xf32>
    %74 = vector.multi_reduction <maximumf>, %73, %cst_50 [1] : vector<1x10xf32> to vector<1xf32>
    %75 = vector.shape_cast %74 : vector<1xf32> to vector<1x1xf32>
    %76 = vector.broadcast %75 : vector<1x1xf32> to vector<1x10xf32>
    %77 = arith.subf %73, %76 : vector<1x10xf32>
    %78 = math.exp %77 : vector<1x10xf32>
    %cst_51 = arith.constant dense<0.000000e+00> : vector<1xf32>
    %79 = vector.multi_reduction <add>, %78, %cst_51 [1] : vector<1x10xf32> to vector<1xf32>
    %80 = vector.shape_cast %79 : vector<1xf32> to vector<1x1xf32>
    %81 = tpu.reciprocal %80 {approx = true} : vector<1x1xf32> -> vector<1x1xf32>
    %82 = vector.broadcast %81 : vector<1x1xf32> to vector<1x10xf32>
    %83 = arith.mulf %78, %82 : vector<1x10xf32>
    %c1_52 = arith.constant 1 : index
    %c0_53 = arith.constant 0 : index
    %84 = vector.load %arg8[%c1_52, %c0_53] : memref<2x10xf32, #tpu.memory_space<vmem>>, vector<1x10xf32>
    tpu.vector_store %arg8[%c1_52, %c0_53], %83 {strides = array<i32>} : memref<2x10xf32, #tpu.memory_space<vmem>>, vector<1x10xf32>,
    return
  }
  func.func @transform_0(%arg0: i32) -> (i32, i32, i32) {
    %c0_i32 = arith.constant 0 : i32
    %c0_i32_0 = arith.constant 0 : i32
    %c0_i32_1 = arith.constant 0 : i32
    return %arg0, %c0_i32, %c0_i32_0 : i32, i32, i32
  }
  func.func @transform_1(%arg0: i32) -> (i32, i32) {
    %c0_i32 = arith.constant 0 : i32
    %c0_i32_0 = arith.constant 0 : i32
    %c0_i32_1 = arith.constant 0 : i32
    return %c0_i32, %c0_i32_0 : i32, i32
  }
  func.func @transform_2(%arg0: i32) -> (i32, i32) {
    %c0_i32 = arith.constant 0 : i32
    %c0_i32_0 = arith.constant 0 : i32
    %c0_i32_1 = arith.constant 0 : i32
    return %c0_i32, %c0_i32_0 : i32, i32
  }
  func.func @transform_3(%arg0: i32) -> (i32, i32, i32) {
    %c0_i32 = arith.constant 0 : i32
    %c0_i32_0 = arith.constant 0 : i32
    %c0_i32_1 = arith.constant 0 : i32
    %c0_i32_2 = arith.constant 0 : i32
    return %c0_i32, %c0_i32_0, %c0_i32_1 : i32, i32, i32
  }
  func.func @transform_4(%arg0: i32) -> (i32, i32) {
    %c0_i32 = arith.constant 0 : i32
    %c0_i32_0 = arith.constant 0 : i32
    %c0_i32_1 = arith.constant 0 : i32
    return %c0_i32, %c0_i32_0 : i32, i32
  }
  func.func @transform_5(%arg0: i32) -> (i32, i32) {
    %c0_i32 = arith.constant 0 : i32
    %c0_i32_0 = arith.constant 0 : i32
    %c0_i32_1 = arith.constant 0 : i32
    return %c0_i32, %c0_i32_0 : i32, i32
  }
  func.func @transform_6(%arg0: i32) -> (i32, i32) {
    %c0_i32 = arith.constant 0 : i32
    %c0_i32_0 = arith.constant 0 : i32
    %c0_i32_1 = arith.constant 0 : i32
    return %c0_i32, %c0_i32_0 : i32, i32
  }
  func.func @transform_7(%arg0: i32) -> (i32, i32) {
    %c0_i32 = arith.constant 0 : i32
    %c0_i32_0 = arith.constant 0 : i32
    return %arg0, %c0_i32 : i32, i32
  }
}

</mosaic_0001>

<bundles_post_ra>
// kernel: _forward_impl.1
= control target key start
LH: loop header
LB: loop body
LE: loop exit
PB: predicated region body
PF: predicated region fallthrough
CT: control target
= control target key end

     0   :  { %vm107_vm0 = vcmask 1040384   ;;  %v1616_v31 = vmov 0   ;;  %vm103_vm1 = vcmask 662528   ;;  %s3177_s0 = inlined_call_operand.vmem [shape: f32[2,81,225], index: 0, kind: input, shape index: {}]   ;;  %s3178_s1 = inlined_call_operand.vmem [shape: f32[3,81], index: 1, kind: input, shape index: {}]   ;;  %s3179_s2 = inlined_call_operand.vmem [shape: f32[3,1], index: 2, kind: input, shape index: {}]   ;;  %s3180_s3 = inlined_call_operand.vmem [shape: f32[3,225,169], index: 3, kind: input, shape index: {}]   ;;  %s3181_s4 = inlined_call_operand.<no memory space> [shape: f32[1,1], index: 4, kind: input, shape index: {}]   ;;  %s3182_s5 = inlined_call_operand.vmem [shape: f32[169,10], index: 5, kind: input, shape index: {}]   ;;  %s3183_s6 = inlined_call_operand.vmem [shape: f32[1,10], index: 6, kind: input, shape index: {}]   ;;  %s3184_s7 = inlined_call_operand.hbm [shape: f32[2,10], index: 7, kind: output, shape index: {}]  }
   0x1   :  { %v79_v0 = vld [vmem:[%s3177_s0 + $0xa0] sm:$0x1]  ;;  %v80_v1 = vld [vmem:[%s3177_s0 + $0xa8] sm:$0x1]  ;;  %v77_v2 = vld [vmem:[%s3177_s0 + $0x90] sm:$0xff]  ;;  %1580 = vset.pattern.permute.xlu0 %v1616_v31 }
   0x2   :  { %v101_v3 = vmax.f32 %v79_v0, 0.0  ;;  %v102_v4 = vmax.f32 %v80_v1, 0.0  ;;  %v99_v5 = vmax.f32 %v77_v2, 0.0  ;;  %v78_v6 = vld [vmem:[%s3177_s0 + $0x98] sm:$0xff]  ;;  %v75_v7 = vld [vmem:[%s3177_s0 + $0x80] sm:$0xff]  ;;  %v76_v8 = vld [vmem:[%s3177_s0 + $0x88] sm:$0xff] }
   0x3   :  { %v100_v9 = vmax.f32 %v78_v6, 0.0  ;;  %v73_v10 = vld [vmem:[%s3177_s0 + $0x70] sm:$0xff]  ;;  %v74_v11 = vld [vmem:[%s3177_s0 + $0x78] sm:$0xff]  ;;  %v97_v12 = vmax.f32 %v75_v7, 0.0  ;;  %v98_v13 = vmax.f32 %v76_v8, 0.0  ;;  %v71_v14 = vld [vmem:[%s3177_s0 + $0x60] sm:$0xff] }
   0x4   :  { %1288 = vmatpush.msk.msra.mxu0 %vm107_vm0, %v101_v3  ;;  %1290 = vmatpush.msk.msra.mxu1 %vm107_vm0, %v102_v4  ;;  %v72_v15 = vld [vmem:[%s3177_s0 + $0x68] sm:$0xff]  ;;  %v95_v16 = vmax.f32 %v73_v10, 0.0  ;;  %v96_v17 = vmax.f32 %v74_v11, 0.0  ;;  %v69_v18 = vld [vmem:[%s3177_s0 + $0x50] sm:$0xff]  ;;  %v70_v19 = vld [vmem:[%s3177_s0 + $0x58] sm:$0xff]  ;;  %v93_v20 = vmax.f32 %v71_v14, 0.0 }
   0x5   :  { %v94_v21 = vmax.f32 %v72_v15, 0.0  ;;  %v67_v22 = vld [vmem:[%s3177_s0 + $0x40] sm:$0xff]  ;;  %v68_v23 = vld [vmem:[%s3177_s0 + $0x48] sm:$0xff]  ;;  %v91_v25 = vmax.f32 %v69_v18, 0.0  ;;  %v92_v26 = vmax.f32 %v70_v19, 0.0  ;;  %v65_v29 = vld [vmem:[%s3177_s0 + $0x30] sm:$0xff] }
   0x6   :  { %120 = vmatpush.msra.mxu0 %v99_v5  ;;  %140 = vmatpush.msra.mxu1 %v100_v9  ;;  %v1322_v24 = vld [vmem:[%s3180_s3 + $0x2c0] sm:$0xff]  ;;  %v1348_v28 = vld [vmem:[%s3180_s3 + $0x390] sm:$0x1]  ;;  %v66_v30 = vld [vmem:[%s3177_s0 + $0x38] sm:$0xff]  ;;  %v89_v32 = vmax.f32 %v67_v22, 0.0  ;;  %v90_v33 = vmax.f32 %v68_v23, 0.0 }
   0x7   :  { %v29_v27 = vld [vmem:[%s3179_s2] sm:$0x7]  ;;  %287 = vmatpush.msra.mxu2 %v1322_v24  ;;  %v1320_v34 = vld [vmem:[%s3180_s3 + $0x2b0] sm:$0xff]  ;;  %v64_v37 = vld [vmem:[%s3177_s0 + $0x28] sm:$0xff]  ;;  %1350 = vmatpush.msk.msra.mxu3 %vm107_vm0, %v1348_v28  ;;  %v87_v38 = vmax.f32 %v65_v29, 0.0  ;;  %v88_v39 = vmax.f32 %v66_v30, 0.0 }
   0x8   :  { %121 = vmatpush.msra.mxu0 %v97_v12  ;;  %141 = vmatpush.msra.mxu1 %v98_v13  ;;  %v1723_v35 = vld [vmem:[%s3180_s3 + $0x380] sm:$0xff]  ;;  %v1738_v41 = vld [vmem:[%s3180_s3 + $0x370] sm:$0xff]  ;;  %v62_v43 = vld [vmem:[%s3177_s0 + $0x18] sm:$0xff]  ;;  %v86_v45 = vmax.f32 %v64_v37, 0.0 }
   0x9   :  { %v63_v36 = vld [vmem:[%s3177_s0 + $0x20] sm:$0xff]  ;;  %32 = vperm.xlu0 %1580, %v29_v27   ;;  %v61_v42 = vld [vmem:[%s3177_s0 + $0x10] sm:$0xff]  ;;  %288 = vmatpush.msra.mxu2 %v1320_v34  ;;  %v60_v49 = vld [vmem:[%s3177_s0 + $0x8] sm:$0xff]  ;;  %v84_v51 = vmax.f32 %v62_v43, 0.0 }
   0xa   :  { %122 = vmatpush.msra.mxu0 %v95_v16  ;;  %142 = vmatpush.msra.mxu1 %v96_v17  ;;  %v1318_v40 = vld [vmem:[%s3180_s3 + $0x2a0] sm:$0xff]  ;;  %v85_v44 = vmax.f32 %v63_v36, 0.0  ;;  %v1316_v46 = vld [vmem:[%s3180_s3 + $0x290] sm:$0xff]  ;;  %v83_v50 = vmax.f32 %v61_v42, 0.0  ;;  %v82_v55 = vmax.f32 %v60_v49, 0.0  ;;  %v1323_v59 = vld [vmem:[%s3180_s3 + $0x2c8] sm:$0xff] }
   0xb   :  { %311 = vmatpush.msra.mxu3 %v1723_v35  ;;  %v1753_v47 = vld [vmem:[%s3180_s3 + $0x360] sm:$0xff]  ;;  %289 = vmatpush.msra.mxu2 %v1318_v40  ;;  %v1768_v53 = vld [vmem:[%s3180_s3 + $0x350] sm:$0xff]  ;;  %v1349_v60 = vld [vmem:[%s3180_s3 + $0x398] sm:$0x1] }
   0xc   :  { %123 = vmatpush.msra.mxu0 %v93_v20  ;;  %143 = vmatpush.msra.mxu1 %v94_v21  ;;  %v59_v48 = vld [vmem:[%s3177_s0] sm:$0xff]  ;;  %v1312_v56 = vld [vmem:[%s3180_s3 + $0x270] sm:$0xff]  ;;  %v1321_v63 = vld [vmem:[%s3180_s3 + $0x2b8] sm:$0xff] }
   0xd   :  { %312 = vmatpush.msra.mxu3 %v1738_v41  ;;  %v1314_v52 = vld [vmem:[%s3180_s3 + $0x280] sm:$0xff]  ;;  %290 = vmatpush.msra.mxu2 %v1316_v46  ;;  %v81_v54 = vmax.f32 %v59_v48, 0.0  ;;  %v1798_v62 = vld [vmem:[%s3180_s3 + $0x330] sm:$0xff]  ;;  %v1810_v0 = vld [vmem:[%s3180_s3 + $0x388] sm:$0xff] }
   0xe   :  { %124 = vmatpush.msra.mxu0 %v91_v25  ;;  %144 = vmatpush.msra.mxu1 %v92_v26  ;;  %v1777_v57 = vld [vmem:[%s3180_s3 + $0x340] sm:$0xff]  ;;  %v1308_v1 = vld [vmem:[%s3180_s3 + $0x250] sm:$0xff]  ;;  %v1319_v3 = vld [vmem:[%s3180_s3 + $0x2a8] sm:$0xff] }
   0xf   :  { %313 = vmatpush.msra.mxu3 %v1753_v47  ;;  %291 = vmatpush.msra.mxu2 %v1314_v52  ;;  %v1783_v58 = vld [vmem:[%s3178_s1] sm:$0x7]  ;;  %v1827_v4 = vld [vmem:[%s3180_s3 + $0x378] sm:$0xff]  ;;  %v1837_v6 = vld [vmem:[%s3180_s3 + $0x310] sm:$0xff] }
  0x10   :  { %125 = vmatpush.msra.mxu0 %v89_v32  ;;  %145 = vmatpush.msra.mxu1 %v90_v33  ;;  %v1310_v61 = vld [vmem:[%s3180_s3 + $0x260] sm:$0xff]  ;;  %v1317_v7 = vld [vmem:[%s3180_s3 + $0x298] sm:$0xff]  ;;  %v1845_v8 = vld [vmem:[%s3180_s3 + $0x368] sm:$0xff] }
  0x11   :  { %314 = vmatpush.msra.mxu3 %v1768_v53  ;;  %292 = vmatpush.msra.mxu2 %v1312_v56  ;;  %v1819_v2 = vld [vmem:[%s3180_s3 + $0x320] sm:$0xff]  ;;  %v1304_v9 = vld [vmem:[%s3180_s3 + $0x230] sm:$0xff]  ;;  %v1315_v11 = vld [vmem:[%s3180_s3 + $0x288] sm:$0xff] }
  0x12   :  { %126 = vmatpush.msra.mxu0 %v87_v38  ;;  %146 = vmatpush.msra.mxu1 %v88_v39  ;;  %v1306_v5 = vld [vmem:[%s3180_s3 + $0x240] sm:$0xff]  ;;  %v1863_v12 = vld [vmem:[%s3180_s3 + $0x358] sm:$0xff]  ;;  %v1873_v14 = vld [vmem:[%s3180_s3 + $0x2f0] sm:$0xff] }
  0x13   :  { %315 = vmatpush.msra.mxu3 %v1777_v57  ;;  %293 = vmatpush.msra.mxu2 %v1310_v61  ;;  %v1855_v10 = vld [vmem:[%s3180_s3 + $0x300] sm:$0xff]  ;;  %v1313_v15 = vld [vmem:[%s3180_s3 + $0x278] sm:$0xff]  ;;  %v1881_v16 = vld [vmem:[%s3180_s3 + $0x348] sm:$0xff] }
  0x14   :  { %127 = vmatpush.msra.mxu0 %v85_v44  ;;  %147 = vmatpush.msra.mxu1 %v86_v45  ;;  %v1302_v13 = vld [vmem:[%s3180_s3 + $0x220] sm:$0xff]  ;;  %v1300_v17 = vld [vmem:[%s3180_s3 + $0x210] sm:$0xff]  ;;  %v1311_v19 = vld [vmem:[%s3180_s3 + $0x268] sm:$0xff] }
  0x15   :  { %316 = vmatpush.msra.mxu3 %v1798_v62  ;;  %294 = vmatpush.msra.mxu2 %v1308_v1  ;;  %v1891_v18 = vld [vmem:[%s3180_s3 + $0x2e0] sm:$0xff]  ;;  %v1899_v20 = vld [vmem:[%s3180_s3 + $0x338] sm:$0xff]  ;;  %v1909_v22 = vld [vmem:[%s3180_s3 + $0x2d0] sm:$0xff] }
  0x16   :  { %128 = vmatpush.msra.mxu0 %v83_v50  ;;  %148 = vmatpush.msra.mxu1 %v84_v51  ;;  %v1298_v21 = vld [vmem:[%s3180_s3 + $0x200] sm:$0xff]  ;;  %v1309_v23 = vld [vmem:[%s3180_s3 + $0x258] sm:$0xff]  ;;  %v1917_v24 = vld [vmem:[%s3180_s3 + $0x328] sm:$0xff] }
  0x17   :  { %317 = vmatpush.msra.mxu3 %v1819_v2  ;;  %295 = vmatpush.msra.mxu2 %v1306_v5  ;;  %v1924_v25 = vld [vmem:[%s3180_s3 + $0xf0] sm:$0xff]  ;;  %v1307_v27 = vld [vmem:[%s3180_s3 + $0x248] sm:$0xff]  ;;  %v1935_v28 = vld [vmem:[%s3180_s3 + $0x318] sm:$0xff] }
  0x18   :  { %129 = vmatpush.msra.mxu0 %v81_v54  ;;  %149 = vmatpush.msra.mxu1 %v82_v55  ;;  %v1296_v26 = vld [vmem:[%s3180_s3 + $0x1f0] sm:$0xff]  ;;  %v1942_v29 = vld [vmem:[%s3180_s3 + $0xe0] sm:$0xff]  ;;  %v1305_v31 = vld [vmem:[%s3180_s3 + $0x238] sm:$0xff] }
  0x19   :  { %1289 = vmatmul.msk.f32.vlgmr.msra.gmra.mxu0 %vm103_vm1, %v1783_v58  ;;  %1291 = vmatmul.msk.f32.vlgmr.msra.gmra.mxu1 %vm103_vm1, %v1783_v58  ;;  %v1294_v30 = vld [vmem:[%s3180_s3 + $0x1e0] sm:$0xff]  ;;  %v1953_v32 = vld [vmem:[%s3180_s3 + $0x308] sm:$0xff]  ;;  %v1960_v33 = vld [vmem:[%s3180_s3 + $0xd0] sm:$0xff] }
  0x1a   :  { %327 = vmatpush.msrb.mxu0 %v1323_v59  ;;  %1352 = vmatpush.msk.msrb.mxu1 %vm107_vm0, %v1349_v60  ;;  %v1292_v34 = vld [vmem:[%s3180_s3 + $0x1d0] sm:$0xff]  ;;  %v1303_v36 = vld [vmem:[%s3180_s3 + $0x228] sm:$0xff]  ;;  %v1971_v37 = vld [vmem:[%s3180_s3 + $0x2f8] sm:$0xff] }
  0x1b   :  { %318 = vmatpush.msra.mxu3 %v1837_v6  ;;  %296 = vmatpush.msra.mxu2 %v1304_v9 }
  0x1c   :  { %328 = vmatpush.msrb.mxu0 %v1321_v63  ;;  %351 = vmatpush.msrb.mxu1 %v1810_v0 }
  0x1d   :  { %319 = vmatpush.msra.mxu3 %v1855_v10  ;;  %297 = vmatpush.msra.mxu2 %v1302_v13 }
  0x1e   :  { %329 = vmatpush.msrb.mxu0 %v1319_v3  ;;  %352 = vmatpush.msrb.mxu1 %v1827_v4 }
  0x1f   :  { %320 = vmatpush.msra.mxu3 %v1873_v14  ;;  %298 = vmatpush.msra.mxu2 %v1300_v17 }
  0x20   :  { %330 = vmatpush.msrb.mxu0 %v1317_v7  ;;  %353 = vmatpush.msrb.mxu1 %v1845_v8 }
  0x21   :  { %321 = vmatpush.msra.mxu3 %v1891_v18  ;;  %299 = vmatpush.msra.mxu2 %v1298_v21 }
  0x22   :  { %331 = vmatpush.msrb.mxu0 %v1315_v11  ;;  %354 = vmatpush.msrb.mxu1 %v1863_v12 }
  0x23   :  { %322 = vmatpush.msra.mxu3 %v1909_v22  ;;  %300 = vmatpush.msra.mxu2 %v1296_v26 }
  0x24   :  { %332 = vmatpush.msrb.mxu0 %v1313_v15  ;;  %355 = vmatpush.msrb.mxu1 %v1881_v16 }
  0x25   :  { %375 = vmatpush.msrb.mxu3 %v1924_v25  ;;  %301 = vmatpush.msra.mxu2 %v1294_v30 }
  0x26   :  { %333 = vmatpush.msrb.mxu0 %v1311_v19  ;;  %356 = vmatpush.msrb.mxu1 %v1899_v20 }
  0x27   :  { %376 = vmatpush.msrb.mxu3 %v1942_v29 }
  0x28   :  { %334 = vmatpush.msrb.mxu0 %v1309_v23  ;;  %357 = vmatpush.msrb.mxu1 %v1917_v24 }
  0x2a   :  { %335 = vmatpush.msrb.mxu0 %v1307_v27  ;;  %358 = vmatpush.msrb.mxu1 %v1935_v28 }
  0x2b   :  { %13 = vsyncpa [#allocation4], 0  ;;  %v1978_v38 = vld [vmem:[%s3180_s3 + $0xc0] sm:$0xff]  ;;  %v1301_v40 = vld [vmem:[%s3180_s3 + $0x218] sm:$0xff]  ;;  %377 = vmatpush.msrb.mxu3 %v1960_v33  ;;  %302 = vmatpush.msra.mxu2 %v1292_v34  ;;  %vm278_vm2 = vcmask 793600   ;;  %vm612_vm3 = vcmask 334848  }
  0x2c   :  { %336 = vmatpush.msrb.mxu0 %v1305_v31  ;;  %359 = vmatpush.msrb.mxu1 %v1953_v32  ;;  %v212_v39 = vld [vmem:[%s3180_s3 + $0x1c0] sm:$0x1]  ;;  %v1989_v42 = vld [vmem:[%s3180_s3 + $0x2e8] sm:$0xff]  ;;  %v1996_v43 = vld [vmem:[%s3180_s3 + $0xb0] sm:$0xff]  ;;  %vm659_vm4 = vcmask 73728   ;;  %s1279_s27 = sshll.u32 %s3184_s7, 4  ;;  %s1280_s27 = int_to_ptr.hbm [resolvable:$true] %s1279_s27 }
  0x2d   :  { %v210_v44 = vld [vmem:[%s3180_s3 + $0x1b0] sm:$0xff]  ;;  %v1299_v45 = vld [vmem:[%s3180_s3 + $0x208] sm:$0xff]  ;;  %v2007_v46 = vld [vmem:[%s3180_s3 + $0x2d8] sm:$0xff]  ;;  %378 = vmatpush.msrb.mxu3 %v1978_v38  ;;  %1354 = vmatpush.msk.msrb.mxu2 %vm107_vm0, %v212_v39 }
  0x2e   :  { %337 = vmatpush.msrb.mxu0 %v1303_v36  ;;  %360 = vmatpush.msrb.mxu1 %v1971_v37  ;;  %v2015_v48 = vld [vmem:[%s3180_s3 + $0xf8] sm:$0xff]  ;;  %v2020_v49 = vld [vmem:[%s3180_s3 + $0xa0] sm:$0xff]  ;;  %v2033_v52 = vld [vmem:[%s3180_s3 + $0xe8] sm:$0xff] }
  0x2f   :  { %v1297_v50 = vld [vmem:[%s3180_s3 + $0x1f8] sm:$0xff]  ;;  %379 = vmatpush.msrb.mxu3 %v1996_v43  ;;  %399 = vmatpush.msrb.mxu2 %v210_v44  ;;  %v208_v51 = vld [vmem:[%s3180_s3 + $0x1a0] sm:$0xff]  ;;  %v2038_v54 = vld [vmem:[%s3180_s3 + $0x90] sm:$0xff] }
  0x30   :  { %338 = vmatpush.msrb.mxu0 %v1301_v40  ;;  %361 = vmatpush.msrb.mxu1 %v1989_v42  ;;  %v1295_v55 = vld [vmem:[%s3180_s3 + $0x1e8] sm:$0xff]  ;;  %v206_v56 = vld [vmem:[%s3180_s3 + $0x190] sm:$0xff]  ;;  %v2051_v59 = vld [vmem:[%s3180_s3 + $0xd8] sm:$0xff] }
  0x31   :  { %380 = vmatpush.msrb.mxu3 %v2020_v49  ;;  %400 = vmatpush.msrb.mxu2 %v208_v51  ;;  %v2056_v60 = vld [vmem:[%s3180_s3 + $0x80] sm:$0xff]  ;;  %v1293_v61 = vld [vmem:[%s3180_s3 + $0x1d8] sm:$0xff]  ;;  %v2069_v1 = vld [vmem:[%s3180_s3 + $0xc8] sm:$0xff] }
  0x32   :  { %339 = vmatpush.msrb.mxu0 %v1299_v45  ;;  %362 = vmatpush.msrb.mxu1 %v2007_v46  ;;  %3231 = vst [vmem:[#allocation6_spill] sm:$0xff] %v2056_v60  ;;  %v204_v63 = vld [vmem:[%s3180_s3 + $0x180] sm:$0xff]  ;;  %v213_v3 = vld [vmem:[%s3180_s3 + $0x1c8] sm:$0x1]  ;;  %v2079_v5 = vld [vmem:[%s3180_s3 + $0x70] sm:$0xff] }
  0x33   :  { %381 = vmatpush.msrb.mxu3 %v2038_v54  ;;  %401 = vmatpush.msrb.mxu2 %v206_v56  ;;  %3232 = vst [vmem:[#allocation7_spill] sm:$0xff] %v2079_v5  ;;  %v202_v7 = vld [vmem:[%s3180_s3 + $0x170] sm:$0xff]  ;;  %v2087_v9 = vld [vmem:[%s3180_s3 + $0xb8] sm:$0xff]  ;;  %v2097_v13 = vld [vmem:[%s3180_s3 + $0x60] sm:$0xff] }
  0x34   :  { %415 = vmatpush.msra.mxu1 %v2015_v48  ;;  %340 = vmatpush.msrb.mxu0 %v1297_v50  ;;  %v211_v11 = vld [vmem:[%s3180_s3 + $0x1b8] sm:$0xff]  ;;  %3233 = vst [vmem:[#allocation8_spill] sm:$0xff] %v2097_v13  ;;  %v200_v15 = vld [vmem:[%s3180_s3 + $0x160] sm:$0xff]  ;;  %v2105_v17 = vld [vmem:[%s3180_s3 + $0xa8] sm:$0xff] }
  0x35   :  { %382 = vmatpush.msrb.mxu3 %v2056_v60  ;;  %402 = vmatpush.msrb.mxu2 %v204_v63  ;;  %v209_v19 = vld [vmem:[%s3180_s3 + $0x1a8] sm:$0xff]  ;;  %v2115_v21 = vld [vmem:[%s3180_s3 + $0x50] sm:$0xff]  ;;  %v2123_v26 = vld [vmem:[%s3180_s3 + $0x98] sm:$0xff] }
  0x36   :  { %416 = vmatpush.msra.mxu1 %v2033_v52  ;;  %341 = vmatpush.msrb.mxu0 %v1295_v55  ;;  %3234 = vst [vmem:[#allocation9_spill] sm:$0xff] %v2115_v21  ;;  %v198_v23 = vld [vmem:[%s3180_s3 + $0x150] sm:$0xff]  ;;  %v207_v27 = vld [vmem:[%s3180_s3 + $0x198] sm:$0xff]  ;;  %v2133_v30 = vld [vmem:[%s3180_s3 + $0x40] sm:$0xff] }
  0x37   :  { %383 = vmatpush.msrb.mxu3 %v2079_v5  ;;  %403 = vmatpush.msrb.mxu2 %v202_v7  ;;  %3235 = vst [vmem:[#allocation10_spill] sm:$0xff] %v2133_v30  ;;  %v196_v31 = vld [vmem:[%s3180_s3 + $0x140] sm:$0xff]  ;;  %v2141_v34 = vld [vmem:[%s3180_s3 + $0x88] sm:$0xff]  ;;  %v2151_v39 = vld [vmem:[%s3180_s3 + $0x30] sm:$0xff] }
  0x38   :  { %417 = vmatpush.msra.mxu1 %v2051_v59  ;;  %342 = vmatpush.msrb.mxu0 %v1293_v61  ;;  %v205_v36 = vld [vmem:[%s3180_s3 + $0x188] sm:$0xff]  ;;  %3236 = vst [vmem:[#allocation11_spill] sm:$0xff] %v2151_v39  ;;  %v194_v40 = vld [vmem:[%s3180_s3 + $0x130] sm:$0xff]  ;;  %v2159_v44 = vld [vmem:[%s3180_s3 + $0x78] sm:$0xff] }
  0x39   :  { %384 = vmatpush.msrb.mxu3 %v2097_v13  ;;  %404 = vmatpush.msrb.mxu2 %v200_v15  ;;  %v203_v45 = vld [vmem:[%s3180_s3 + $0x178] sm:$0xff]  ;;  %v2169_v50 = vld [vmem:[%s3180_s3 + $0x68] sm:$0xff]  ;;  %v192_v15 = vld [vmem:[%s3180_s3 + $0x120] sm:$0xff] }
  0x3a   :  { %418 = vmatpush.msra.mxu1 %v2069_v1  ;;  %1356 = vmatpush.msk.msra.mxu0 %vm107_vm0, %v213_v3  ;;  %v201_v51 = vld [vmem:[%s3180_s3 + $0x168] sm:$0xff]  ;;  %v2179_v55 = vld [vmem:[%s3180_s3 + $0x58] sm:$0xff]  ;;  %v1376_v5 = vld [vmem:[%s3180_s3 + $0x430] sm:$0xff] }
  0x3b   :  { %385 = vmatpush.msrb.mxu3 %v2115_v21  ;;  %405 = vmatpush.msrb.mxu2 %v198_v23  ;;  %v199_v56 = vld [vmem:[%s3180_s3 + $0x158] sm:$0xff]  ;;  %v2188_v61 = vld [vmem:[%s3180_s3 + $0x48] sm:$0xff] }
  0x3c   :  { %419 = vmatpush.msra.mxu1 %v2087_v9  ;;  %439 = vmatpush.msra.mxu0 %v211_v11  ;;  %v197_v63 = vld [vmem:[%s3180_s3 + $0x148] sm:$0xff]  ;;  %v2198_v3 = vld [vmem:[%s3180_s3 + $0x38] sm:$0xff]  ;;  %v2207_v11 = vld [vmem:[%s3180_s3 + $0x20] sm:$0xff] }
  0x3d   :  { %386 = vmatpush.msrb.mxu3 %v2133_v30  ;;  %406 = vmatpush.msrb.mxu2 %v196_v31  ;;  %v195_v7 = vld [vmem:[%s3180_s3 + $0x138] sm:$0xff]  ;;  %3237 = vst [vmem:[#allocation12_spill] sm:$0xff] %v2207_v11  ;;  %v193_v23 = vld [vmem:[%s3180_s3 + $0x128] sm:$0xff]  ;;  %v190_v31 = vld [vmem:[%s3180_s3 + $0x110] sm:$0xff] }
  0x3e   :  { %420 = vmatpush.msra.mxu1 %v2105_v17  ;;  %440 = vmatpush.msra.mxu0 %v209_v19  ;;  %v2215_v19 = vld [vmem:[%s3180_s3 + $0x28] sm:$0xff]  ;;  %v2375_v13 = vld [vmem:[%s3180_s3 + $0x518] sm:$0xff] }
  0x3f   :  { %387 = vmatpush.msrb.mxu3 %v2151_v39  ;;  %407 = vmatpush.msrb.mxu2 %v194_v40  ;;  %v191_v40 = vld [vmem:[%s3180_s3 + $0x118] sm:$0xff]  ;;  %v1414_v39 = vld [vmem:[%s3180_s3 + $0x560] sm:$0x1]  ;;  %v1387_v30 = vld [vmem:[%s3180_s3 + $0x488] sm:$0xff]  ;;  %3248 = vst [vmem:[#allocation23_spill] sm:$0xff] %v2375_v13 }
  0x40   :  { %421 = vmatpush.msra.mxu1 %v2123_v26  ;;  %441 = vmatpush.msra.mxu0 %v207_v27  ;;  %v2225_v27 = vld [vmem:[%s3180_s3 + $0x10] sm:$0xff]  ;;  %v1379_v21 = vld [vmem:[%s3180_s3 + $0x448] sm:$0xff] }
  0x41   :  { %388 = vmatpush.msrb.mxu3 %v2207_v11  ;;  %408 = vmatpush.msrb.mxu2 %v192_v15  ;;  %3238 = vst [vmem:[#allocation13_spill] sm:$0xff] %v2225_v27 }
  0x42   :  { %422 = vmatpush.msra.mxu1 %v2141_v34  ;;  %442 = vmatpush.msra.mxu0 %v205_v36  ;;  %v2233_v36 = vld [vmem:[%s3180_s3 + $0x18] sm:$0xff] }
  0x43   :  { %389 = vmatpush.msrb.mxu3 %v2225_v27  ;;  %409 = vmatpush.msrb.mxu2 %v190_v31 }
  0x44   :  { %423 = vmatpush.msra.mxu1 %v2159_v44  ;;  %443 = vmatpush.msra.mxu0 %v203_v45  ;;  %v2243_v45 = vld [vmem:[%s3180_s3] sm:$0xff] }
  0x45   :  { %3239 = vst [vmem:[#allocation14_spill] sm:$0xff] %v2243_v45  ;;  %390 = vmatpush.msrb.mxu3 %v2243_v45 }
  0x46   :  { %424 = vmatpush.msra.mxu1 %v2169_v50  ;;  %444 = vmatpush.msra.mxu0 %v201_v51  ;;  %v188_v51 = vld [vmem:[%s3180_s3 + $0x100] sm:$0xff] }
  0x47   :  { %410 = vmatpush.msrb.mxu2 %v188_v51 }
  0x48   :  { %425 = vmatpush.msra.mxu1 %v2179_v55  ;;  %445 = vmatpush.msra.mxu0 %v199_v56  ;;  %v2251_v56 = vld [vmem:[%s3180_s3 + $0x8] sm:$0xff] }
  0x4a   :  { %426 = vmatpush.msra.mxu1 %v2188_v61  ;;  %446 = vmatpush.msra.mxu0 %v197_v63  ;;  %v189_v63 = vld [vmem:[%s3180_s3 + $0x108] sm:$0xff] }
  0x4c   :  { %427 = vmatpush.msra.mxu1 %v2198_v3  ;;  %447 = vmatpush.msra.mxu0 %v195_v7 }
  0x4e   :  { %428 = vmatpush.msra.mxu1 %v2215_v19  ;;  %448 = vmatpush.msra.mxu0 %v193_v23 }
  0x50   :  { %429 = vmatpush.msra.mxu1 %v2233_v36  ;;  %449 = vmatpush.msra.mxu0 %v191_v40 }
  0x52   :  { %430 = vmatpush.msra.mxu1 %v2251_v56  ;;  %450 = vmatpush.msra.mxu0 %v189_v63  ;;  %v1388_v63 = vld [vmem:[%s3180_s3 + $0x490] sm:$0xff] }
  0x7b   :  { %v2258_v7 = vpop.permute.xlu0 %32 }
  0x96   :  { %v131_v15 = vpop.f32.mrf.mxu0  ;;  %v151_v23 = vpop.f32.mrf.mxu1 }
  0x97   :  { %v132_v31 = vadd.f32 %v131_v15, %v2258_v7  ;;  %v152_v40 = vadd.f32 %v151_v23, %v2258_v7  ;;  %v1389_v15 = vld [vmem:[%s3180_s3 + $0x498] sm:$0xff]  ;;  %v1415_v23 = vld [vmem:[%s3180_s3 + $0x568] sm:$0x1] }
  0x99   :  { %v2262_v27 = vmax.f32 %v132_v31, 0.0  ;;  %v2264_v11 = vmax.f32 %v152_v40, 0.0  ;;  %v1386_v31 = vld [vmem:[%s3180_s3 + $0x480] sm:$0xff]  ;;  %v2288_v40 = vld [vmem:[%s3180_s3 + $0x550] sm:$0xff] }
  0x9a   :  { %3240 = vst [vmem:[#allocation15_spill] sm:$0xff] %v2288_v40 }
  0x9b   :  { %v275_v51 = vrot.slane %v2262_v27, 1  ;;  %v276_v45 = vrot.slane %v2264_v11, 1 }
  0x9d   :  { %303 = vmatmul.f32.vlgmr.msra.gmra.mxu2 %v275_v51  ;;  %1351 = vmatmul.msk.f32.vlgmr.msra.gmra.mxu3 %vm278_vm2, %v276_v45 }
  0x9e   :  { %343 = vmatmul.f32.vlgmr.msrb.gmra.mxu0 %v275_v51  ;;  %1353 = vmatmul.msk.f32.vlgmr.msrb.gmra.mxu1 %vm278_vm2, %v276_v45  ;;  %v2297_v45 = vld [vmem:[%s3180_s3 + $0x558] sm:$0xff]  ;;  %v1384_v51 = vld [vmem:[%s3180_s3 + $0x470] sm:$0xff] }
  0x9f   :  { %525 = vmatpush.msra.mxu2 %v1388_v63  ;;  %1416 = vmatpush.msk.msra.mxu3 %vm107_vm0, %v1414_v39  ;;  %v2306_v39 = vld [vmem:[%s3180_s3 + $0x540] sm:$0xff]  ;;  %v1385_v63 = vld [vmem:[%s3180_s3 + $0x478] sm:$0xff] }
  0xa0   :  { %565 = vmatpush.msrb.mxu0 %v1389_v15  ;;  %1418 = vmatpush.msk.msrb.mxu1 %vm107_vm0, %v1415_v23  ;;  %3241 = vst [vmem:[#allocation16_spill] sm:$0xff] %v2306_v39  ;;  %v2315_v15 = vld [vmem:[%s3180_s3 + $0x548] sm:$0xff]  ;;  %v1382_v23 = vld [vmem:[%s3180_s3 + $0x460] sm:$0xff] }
  0xa1   :  { %526 = vmatpush.msra.mxu2 %v1386_v31  ;;  %549 = vmatpush.msra.mxu3 %v2288_v40  ;;  %3242 = vst [vmem:[#allocation17_spill] sm:$0xff] %v2315_v15  ;;  %v2324_v31 = vld [vmem:[%s3180_s3 + $0x530] sm:$0xff]  ;;  %v1383_v40 = vld [vmem:[%s3180_s3 + $0x468] sm:$0xff] }
  0xa2   :  { %566 = vmatpush.msrb.mxu0 %v1387_v30  ;;  %589 = vmatpush.msrb.mxu1 %v2297_v45  ;;  %3243 = vst [vmem:[#allocation18_spill] sm:$0xff] %v2324_v31  ;;  %v2333_v30 = vld [vmem:[%s3180_s3 + $0x538] sm:$0xff] }
  0xa3   :  { %527 = vmatpush.msra.mxu2 %v1384_v51  ;;  %550 = vmatpush.msra.mxu3 %v2306_v39  ;;  %3244 = vst [vmem:[#allocation19_spill] sm:$0xff] %v2333_v30  ;;  %v1380_v51 = vld [vmem:[%s3180_s3 + $0x450] sm:$0xff]  ;;  %v2344_v39 = vld [vmem:[%s3180_s3 + $0x520] sm:$0xff] }
  0xa4   :  { %567 = vmatpush.msrb.mxu0 %v1385_v63  ;;  %590 = vmatpush.msrb.mxu1 %v2315_v15  ;;  %3245 = vst [vmem:[#allocation20_spill] sm:$0xff] %v2344_v39  ;;  %v2355_v63 = vld [vmem:[%s3180_s3 + $0x528] sm:$0xff]  ;;  %v1439_v15 = vld [vmem:[%s3177_s0 + $0x138] sm:$0xff] }
  0xa5   :  { %528 = vmatpush.msra.mxu2 %v1382_v23  ;;  %551 = vmatpush.msra.mxu3 %v2324_v31  ;;  %3246 = vst [vmem:[#allocation21_spill] sm:$0xff] %v2355_v63  ;;  %v1378_v23 = vld [vmem:[%s3180_s3 + $0x440] sm:$0xff]  ;;  %v2366_v31 = vld [vmem:[%s3180_s3 + $0x510] sm:$0xff] }
  0xa6   :  { %568 = vmatpush.msrb.mxu0 %v1383_v40  ;;  %591 = vmatpush.msrb.mxu1 %v2333_v30  ;;  %v1381_v40 = vld [vmem:[%s3180_s3 + $0x458] sm:$0xff]  ;;  %3247 = vst [vmem:[#allocation22_spill] sm:$0xff] %v2366_v31 }
  0xa7   :  { %391 = vmatmul.f32.vlgmr.msrb.gmra.mxu3 %v2262_v27  ;;  %1355 = vmatmul.msk.f32.vlgmr.msrb.gmra.mxu2 %vm278_vm2, %v2264_v11  ;;  %v1365_v30 = vld [vmem:[%s3180_s3 + $0x3d8] sm:$0xff] }
  0xa8   :  { %431 = vmatmul.f32.vlgmr.msra.gmra.mxu1 %v2262_v27  ;;  %1357 = vmatmul.msk.f32.vlgmr.msra.gmra.mxu0 %vm278_vm2, %v2264_v11 }
  0xa9   :  { %529 = vmatpush.msra.mxu2 %v1380_v51  ;;  %552 = vmatpush.msra.mxu3 %v2344_v39  ;;  %v2384_v51 = vld [vmem:[%s3180_s3 + $0x500] sm:$0xff]  ;;  %v1377_v39 = vld [vmem:[%s3180_s3 + $0x438] sm:$0xff] }
  0xaa   :  { %569 = vmatpush.msrb.mxu0 %v1381_v40  ;;  %592 = vmatpush.msrb.mxu1 %v2355_v63  ;;  %3249 = vst [vmem:[#allocation24_spill] sm:$0xff] %v2384_v51  ;;  %v2393_v40 = vld [vmem:[%s3180_s3 + $0x508] sm:$0xff]  ;;  %v1374_v63 = vld [vmem:[%s3180_s3 + $0x420] sm:$0xff] }
  0xab   :  { %530 = vmatpush.msra.mxu2 %v1378_v23  ;;  %553 = vmatpush.msra.mxu3 %v2366_v31  ;;  %3250 = vst [vmem:[#allocation25_spill] sm:$0xff] %v2393_v40  ;;  %v2402_v23 = vld [vmem:[%s3180_s3 + $0x4f0] sm:$0xff]  ;;  %v1375_v31 = vld [vmem:[%s3180_s3 + $0x428] sm:$0xff] }
  0xac   :  { %570 = vmatpush.msrb.mxu0 %v1379_v21  ;;  %593 = vmatpush.msrb.mxu1 %v2375_v13  ;;  %3251 = vst [vmem:[#allocation26_spill] sm:$0xff] %v2402_v23  ;;  %v2411_v21 = vld [vmem:[%s3180_s3 + $0x4f8] sm:$0xff]  ;;  %v1372_v13 = vld [vmem:[%s3180_s3 + $0x410] sm:$0xff] }
  0xad   :  { %531 = vmatpush.msra.mxu2 %v1376_v5  ;;  %554 = vmatpush.msra.mxu3 %v2384_v51  ;;  %3252 = vst [vmem:[#allocation27_spill] sm:$0xff] %v2411_v21  ;;  %v2420_v5 = vld [vmem:[%s3180_s3 + $0x4e0] sm:$0xff]  ;;  %v1373_v51 = vld [vmem:[%s3180_s3 + $0x418] sm:$0xff] }
  0xae   :  { %571 = vmatpush.msrb.mxu0 %v1377_v39  ;;  %594 = vmatpush.msrb.mxu1 %v2393_v40  ;;  %3253 = vst [vmem:[#allocation28_spill] sm:$0xff] %v2420_v5  ;;  %v2429_v39 = vld [vmem:[%s3180_s3 + $0x4e8] sm:$0xff]  ;;  %v1370_v40 = vld [vmem:[%s3180_s3 + $0x400] sm:$0xff] }
  0xaf   :  { %532 = vmatpush.msra.mxu2 %v1374_v63  ;;  %555 = vmatpush.msra.mxu3 %v2402_v23  ;;  %3254 = vst [vmem:[#allocation29_spill] sm:$0xff] %v2429_v39  ;;  %v2438_v63 = vld [vmem:[%s3180_s3 + $0x4d0] sm:$0xff]  ;;  %v1371_v23 = vld [vmem:[%s3180_s3 + $0x408] sm:$0xff] }
  0xb0   :  { %572 = vmatpush.msrb.mxu0 %v1375_v31  ;;  %595 = vmatpush.msrb.mxu1 %v2411_v21  ;;  %3255 = vst [vmem:[#allocation30_spill] sm:$0xff] %v2438_v63  ;;  %v2447_v31 = vld [vmem:[%s3180_s3 + $0x4d8] sm:$0xff]  ;;  %v1368_v21 = vld [vmem:[%s3180_s3 + $0x3f0] sm:$0xff] }
  0xb1   :  { %533 = vmatpush.msra.mxu2 %v1372_v13  ;;  %556 = vmatpush.msra.mxu3 %v2420_v5  ;;  %3256 = vst [vmem:[#allocation31_spill] sm:$0xff] %v2447_v31  ;;  %v2456_v13 = vld [vmem:[%s3180_s3 + $0x4c0] sm:$0xff]  ;;  %v1369_v5 = vld [vmem:[%s3180_s3 + $0x3f8] sm:$0xff] }
  0xb2   :  { %573 = vmatpush.msrb.mxu0 %v1373_v51  ;;  %596 = vmatpush.msrb.mxu1 %v2429_v39  ;;  %3257 = vst [vmem:[#allocation32_spill] sm:$0xff] %v2456_v13  ;;  %v2465_v51 = vld [vmem:[%s3180_s3 + $0x4c8] sm:$0xff]  ;;  %v1366_v39 = vld [vmem:[%s3180_s3 + $0x3e0] sm:$0xff] }
  0xb3   :  { %534 = vmatpush.msra.mxu2 %v1370_v40  ;;  %557 = vmatpush.msra.mxu3 %v2438_v63  ;;  %3258 = vst [vmem:[#allocation33_spill] sm:$0xff] %v2465_v51  ;;  %v2474_v40 = vld [vmem:[%s3180_s3 + $0x4b0] sm:$0xff]  ;;  %v1367_v63 = vld [vmem:[%s3180_s3 + $0x3e8] sm:$0xff] }
  0xb4   :  { %574 = vmatpush.msrb.mxu0 %v1371_v23  ;;  %597 = vmatpush.msrb.mxu1 %v2447_v31  ;;  %3259 = vst [vmem:[#allocation34_spill] sm:$0xff] %v2474_v40  ;;  %v2483_v23 = vld [vmem:[%s3180_s3 + $0x4b8] sm:$0xff] }
  0xb5   :  { %535 = vmatpush.msra.mxu2 %v1368_v21  ;;  %558 = vmatpush.msra.mxu3 %v2456_v13  ;;  %3260 = vst [vmem:[#allocation35_spill] sm:$0xff] %v2483_v23  ;;  %v1443_v31 = vld [vmem:[%s3177_s0 + $0x158] sm:$0x1]  ;;  %v1364_v21 = vld [vmem:[%s3180_s3 + $0x3d0] sm:$0xff]  ;;  %v2495_v13 = vld [vmem:[%s3180_s3 + $0x4a0] sm:$0xff] }
  0xb6   :  { %575 = vmatpush.msrb.mxu0 %v1369_v5  ;;  %598 = vmatpush.msrb.mxu1 %v2465_v51  ;;  %3261 = vst [vmem:[#allocation36_spill] sm:$0xff] %v2495_v13  ;;  %v2504_v5 = vld [vmem:[%s3180_s3 + $0x4a8] sm:$0xff]  ;;  %v716_v60 = vmax.f32 %v1443_v31, 0.0 }
  0xb7   :  { %536 = vmatpush.msra.mxu2 %v1366_v39  ;;  %559 = vmatpush.msra.mxu3 %v2474_v40  ;;  %3262 = vst [vmem:[#allocation37_spill] sm:$0xff] %v2504_v5  ;;  %v1441_v51 = vld [vmem:[%s3177_s0 + $0x148] sm:$0xff]  ;;  %v515_v39 = vrot.slane %v2264_v11, 2  ;;  %v1362_v40 = vld [vmem:[%s3180_s3 + $0x3c0] sm:$0xff]  ;;  %v2525_v11 = vld [vmem:[%s3182_s5 + $0x78] sm:$0xff] }
  0xb8   :  { %576 = vmatpush.msrb.mxu0 %v1367_v63  ;;  %599 = vmatpush.msrb.mxu1 %v2483_v23  ;;  %v1363_v63 = vld [vmem:[%s3180_s3 + $0x3c8] sm:$0xff]  ;;  %v714_v31 = vmax.f32 %v1441_v51, 0.0  ;;  %v1361_v51 = vld [vmem:[%s3180_s3 + $0x3b8] sm:$0xff] }
  0xb9   :  { %537 = vmatpush.msra.mxu2 %v1364_v21  ;;  %560 = vmatpush.msra.mxu3 %v2495_v13  ;;  %v1437_v21 = vld [vmem:[%s3177_s0 + $0x128] sm:$0xff]  ;;  %v712_v13 = vmax.f32 %v1439_v15, 0.0  ;;  %v514_v15 = vrot.slane %v2262_v27, 2 }
  0xba   :  { %577 = vmatpush.msrb.mxu0 %v1365_v30  ;;  %600 = vmatpush.msrb.mxu1 %v2504_v5  ;;  %v1360_v30 = vld [vmem:[%s3180_s3 + $0x3b0] sm:$0xff]  ;;  %v1435_v5 = vld [vmem:[%s3177_s0 + $0x118] sm:$0xff]  ;;  %v1429_v27 = vld [vmem:[%s3177_s0 + $0xe8] sm:$0xff] }
  0xbb   :  { %1417 = vmatmul.msk.f32.vlgmr.msra.gmra.mxu3 %vm278_vm2, %v515_v39  ;;  %1419 = vmatmul.msk.f32.vlgmr.msrb.gmra.mxu1 %vm278_vm2, %v515_v39  ;;  %v1358_v39 = vld [vmem:[%s3180_s3 + $0x3a0] sm:$0xff]  ;;  %v708_v23 = vmax.f32 %v1435_v5, 0.0  ;;  %v702_v5 = vmax.f32 %v1429_v27, 0.0  ;;  %v2603_v27 = vld [vmem:[%s3182_s5 + $0x48] sm:$0xff] }
  0xbc   :  { %1446 = vmatpush.msk.msra.mxu1 %vm107_vm0, %v716_v60  ;;  %538 = vmatpush.msra.mxu2 %v1362_v40  ;;  %v1359_v60 = vld [vmem:[%s3180_s3 + $0x3a8] sm:$0xff]  ;;  %v710_v40 = vmax.f32 %v1437_v21, 0.0 }
  0xbd   :  { %578 = vmatpush.msrb.mxu0 %v1363_v63  ;;  %619 = vmatpush.msrb.mxu3 %v2525_v11  ;;  %v1433_v63 = vld [vmem:[%s3177_s0 + $0x108] sm:$0xff] }
  0xbe   :  { %749 = vmatpush.msra.mxu1 %v714_v31  ;;  %539 = vmatpush.msra.mxu2 %v1360_v30  ;;  %v1431_v31 = vld [vmem:[%s3177_s0 + $0xf8] sm:$0xff]  ;;  %v706_v30 = vmax.f32 %v1433_v63, 0.0  ;;  %v2578_v63 = vld [vmem:[%s3182_s5 + $0x68] sm:$0xff] }
  0xbf   :  { %579 = vmatpush.msrb.mxu0 %v1361_v51  ;;  %v704_v21 = vmax.f32 %v1431_v31, 0.0  ;;  %v1425_v51 = vld [vmem:[%s3177_s0 + $0xc8] sm:$0xff]  ;;  %v2584_v31 = vld [vmem:[%s3182_s5 + $0x60] sm:$0xff] }
  0xc0   :  { %750 = vmatpush.msra.mxu1 %v712_v13  ;;  %540 = vmatpush.msra.mxu2 %v1358_v39  ;;  %v1427_v13 = vld [vmem:[%s3177_s0 + $0xd8] sm:$0xff] }
  0xc1   :  { %580 = vmatpush.msrb.mxu0 %v1359_v60  ;;  %541 = vmatmul.f32.vlgmr.msra.gmra.mxu2 %v514_v15  ;;  %v700_v39 = vmax.f32 %v1427_v13, 0.0  ;;  %v1423_v60 = vld [vmem:[%s3177_s0 + $0xb8] sm:$0xff] }
  0xc2   :  { %581 = vmatmul.f32.vlgmr.msrb.gmra.mxu0 %v514_v15  ;;  %751 = vmatpush.msra.mxu1 %v710_v40  ;;  %v698_v40 = vmax.f32 %v1425_v51, 0.0  ;;  %v2573_v15 = vld [vmem:[%s3182_s5 + $0x70] sm:$0xff]  ;;  %v2615_v13 = vld [vmem:[%s3182_s5 + $0x38] sm:$0xff]  ;;  %v2625_v51 = vld [vmem:[%s3182_s5 + $0xa8] sm:$0x1] }
  0xc3   :  { %620 = vmatpush.msrb.mxu3 %v2573_v15  ;;  %3264 = vst [vmem:[#allocation39_spill] sm:$0xff] %v2615_v13  ;;  %1420 = vmatpush.msk.msrb.mxu2 %vm107_vm0, %v2625_v51 }
  0xc4   :  { %752 = vmatpush.msra.mxu1 %v708_v23  ;;  %v696_v23 = vmax.f32 %v1423_v60, 0.0  ;;  %3266 = vst [vmem:[#allocation41_spill] sm:$0xff] %v2625_v51  ;;  %v2638_v60 = vld [vmem:[%s3182_s5 + $0x28] sm:$0xff]  ;;  %v2655_v51 = vld [vmem:[%s3182_s5 + $0x90] sm:$0xff] }
  0xc5   :  { %621 = vmatpush.msrb.mxu3 %v2578_v63  ;;  %3268 = vst [vmem:[#allocation43_spill] sm:$0xff] %v2638_v60 }
  0xc6   :  { %753 = vmatpush.msra.mxu1 %v706_v30  ;;  %v2597_v30 = vld [vmem:[%s3182_s5 + $0x50] sm:$0xff]  ;;  %3271 = vst [vmem:[#allocation46_spill] sm:$0xff] %v2655_v51 }
  0xc7   :  { %622 = vmatpush.msrb.mxu3 %v2584_v31 }
  0xc8   :  { %754 = vmatpush.msra.mxu1 %v704_v21  ;;  %v2608_v21 = vld [vmem:[%s3182_s5 + $0x40] sm:$0xff] }
  0xc9   :  { %3263 = vst [vmem:[#allocation38_spill] sm:$0xff] %v2608_v21 }
  0xca   :  { %755 = vmatpush.msra.mxu1 %v702_v5  ;;  %v2620_v5 = vld [vmem:[%s3182_s5 + $0x30] sm:$0xff] }
  0xcb   :  { %3265 = vst [vmem:[#allocation40_spill] sm:$0xff] %v2620_v5 }
  0xcc   :  { %756 = vmatpush.msra.mxu1 %v700_v39  ;;  %v2633_v39 = vld [vmem:[%s3182_s5 + $0xa0] sm:$0xff] }
  0xcd   :  { %3267 = vst [vmem:[#allocation42_spill] sm:$0xff] %v2633_v39  ;;  %650 = vmatpush.msrb.mxu2 %v2633_v39  ;;  %v2667_v39 = vld [vmem:[%s3182_s5 + $0x88] sm:$0xff] }
  0xce   :  { %757 = vmatpush.msra.mxu1 %v698_v40  ;;  %v2643_v40 = vld [vmem:[%s3182_s5 + $0x98] sm:$0xff]  ;;  %3273 = vst [vmem:[#allocation48_spill] sm:$0xff] %v2667_v39 }
  0xcf   :  { %3269 = vst [vmem:[#allocation44_spill] sm:$0xff] %v2643_v40  ;;  %651 = vmatpush.msrb.mxu2 %v2643_v40  ;;  %v2682_v40 = vld [vmem:[%s3182_s5 + $0x8] sm:$0xff] }
  0xd0   :  { %758 = vmatpush.msra.mxu1 %v696_v23  ;;  %v2650_v23 = vld [vmem:[%s3182_s5 + $0x20] sm:$0xff]  ;;  %3275 = vst [vmem:[#allocation50_spill] sm:$0xff] %v2682_v40 }
  0xd1   :  { %1447 = vmatmul.msk.f32.vlgmr.msra.gmra.mxu1 %vm103_vm1, %v1783_v58  ;;  %v2591_v58 = vld [vmem:[%s3182_s5 + $0x58] sm:$0xff]  ;;  %3270 = vst [vmem:[#allocation45_spill] sm:$0xff] %v2650_v23  ;;  %652 = vmatpush.msrb.mxu2 %v2655_v51  ;;  %v2687_v51 = vld [vmem:[%s3182_s5 + $0x80] sm:$0xff] }
  0xd2   :  { %623 = vmatpush.msrb.mxu3 %v2591_v58  ;;  %3276 = vst [vmem:[#allocation51_spill] sm:$0xff] %v2687_v51 }
  0xd3   :  { %653 = vmatpush.msrb.mxu2 %v2667_v39  ;;  %v2696_v39 = vld [vmem:[%s3182_s5] sm:$0xff] }
  0xd4   :  { %624 = vmatpush.msrb.mxu3 %v2597_v30 }
  0xd5   :  { %654 = vmatpush.msrb.mxu2 %v2687_v51  ;;  %v1438_v51 = vld [vmem:[%s3177_s0 + $0x130] sm:$0xff] }
  0xd6   :  { %625 = vmatpush.msrb.mxu3 %v2603_v27 }
  0xd8   :  { %626 = vmatpush.msrb.mxu3 %v2608_v21 }
  0xda   :  { %627 = vmatpush.msrb.mxu3 %v2615_v13  ;;  %v1440_v13 = vld [vmem:[%s3177_s0 + $0x140] sm:$0xff] }
  0xdb   :  { %v713_v21 = vmax.f32 %v1440_v13, 0.0  ;;  %v1436_v13 = vld [vmem:[%s3177_s0 + $0x120] sm:$0xff] }
  0xdc   :  { %628 = vmatpush.msrb.mxu3 %v2620_v5  ;;  %v2662_v5 = vld [vmem:[%s3182_s5 + $0x18] sm:$0xff] }
  0xdd   :  { %3272 = vst [vmem:[#allocation47_spill] sm:$0xff] %v2662_v5 }
  0xde   :  { %629 = vmatpush.msrb.mxu3 %v2638_v60  ;;  %v2674_v60 = vld [vmem:[%s3182_s5 + $0x10] sm:$0xff] }
  0xdf   :  { %3274 = vst [vmem:[#allocation49_spill] sm:$0xff] %v2674_v60 }
  0xe0   :  { %630 = vmatpush.msrb.mxu3 %v2650_v23  ;;  %v1442_v23 = vld [vmem:[%s3177_s0 + $0x150] sm:$0x1] }
  0xe2   :  { %631 = vmatpush.msrb.mxu3 %v2662_v5  ;;  %v715_v5 = vmax.f32 %v1442_v23, 0.0  ;;  %v1504_v23 = vld [vmem:[%s3180_s3 + $0x390] sm:$0x1] }
  0xe4   :  { %632 = vmatpush.msrb.mxu3 %v2674_v60  ;;  %v1505_v60 = vld [vmem:[%s3180_s3 + $0x398] sm:$0x1]  ;;  %1444 = vmatpush.msk.msra.mxu2 %vm107_vm0, %v715_v5  ;;  %v709_v5 = vmax.f32 %v1436_v13, 0.0  ;;  %v1466_v13 = vld [vmem:[%s3180_s3 + $0x260] sm:$0xff] }
  0xe5   :  { %1508 = vmatpush.msk.msrb.mxu1 %vm107_vm0, %v1505_v60 }
  0xe6   :  { %633 = vmatpush.msrb.mxu3 %v2682_v40  ;;  %729 = vmatpush.msra.mxu2 %v713_v21  ;;  %v711_v40 = vmax.f32 %v1438_v51, 0.0 }
  0xe7   :  { %958 = vmatpush.msrb.mxu1 %v1810_v0  ;;  %v1434_v0 = vld [vmem:[%s3177_s0 + $0x110] sm:$0xff] }
  0xe8   :  { %634 = vmatpush.msrb.mxu3 %v2696_v39  ;;  %730 = vmatpush.msra.mxu2 %v711_v40  ;;  %v707_v21 = vmax.f32 %v1434_v0, 0.0 }
  0xe9   :  { %959 = vmatpush.msrb.mxu1 %v1827_v4  ;;  %v1432_v4 = vld [vmem:[%s3177_s0 + $0x100] sm:$0xff] }
  0xea   :  { %1506 = vmatpush.msk.msra.mxu3 %vm107_vm0, %v1504_v23  ;;  %731 = vmatpush.msra.mxu2 %v709_v5 }
  0xeb   :  { %960 = vmatpush.msrb.mxu1 %v1845_v8  ;;  %v1430_v8 = vld [vmem:[%s3177_s0 + $0xf0] sm:$0xff] }
  0xec   :  { %918 = vmatpush.msra.mxu3 %v1723_v35  ;;  %732 = vmatpush.msra.mxu2 %v707_v21  ;;  %v705_v35 = vmax.f32 %v1432_v4, 0.0  ;;  %v2794_v21 = vstv %s3181_s4 }
  0xed   :  { %961 = vmatpush.msrb.mxu1 %v1863_v12  ;;  %v1428_v12 = vld [vmem:[%s3177_s0 + $0xe0] sm:$0xff] }
  0xee   :  { %919 = vmatpush.msra.mxu3 %v1738_v41  ;;  %733 = vmatpush.msra.mxu2 %v705_v35  ;;  %v703_v41 = vmax.f32 %v1430_v8, 0.0 }
  0xef   :  { %962 = vmatpush.msrb.mxu1 %v1881_v16  ;;  %v1426_v16 = vld [vmem:[%s3177_s0 + $0xd0] sm:$0xff] }
  0xf0   :  { %920 = vmatpush.msra.mxu3 %v1753_v47  ;;  %734 = vmatpush.msra.mxu2 %v703_v41  ;;  %v701_v47 = vmax.f32 %v1428_v12, 0.0 }
  0xf1   :  { %963 = vmatpush.msrb.mxu1 %v1899_v20  ;;  %v1424_v20 = vld [vmem:[%s3177_s0 + $0xc0] sm:$0xff] }
  0xf2   :  { %921 = vmatpush.msra.mxu3 %v1768_v53  ;;  %735 = vmatpush.msra.mxu2 %v701_v47  ;;  %v699_v53 = vmax.f32 %v1426_v16, 0.0 }
  0xf3   :  { %964 = vmatpush.msrb.mxu1 %v1917_v24  ;;  %v1422_v24 = vld [vmem:[%s3177_s0 + $0xb0] sm:$0xff] }
  0xf4   :  { %922 = vmatpush.msra.mxu3 %v1777_v57  ;;  %736 = vmatpush.msra.mxu2 %v699_v53  ;;  %v697_v57 = vmax.f32 %v1424_v20, 0.0  ;;  %v1479_v53 = vld [vmem:[%s3180_s3 + $0x2c8] sm:$0xff]  ;;  %v1458_v20 = vld [vmem:[%s3180_s3 + $0x220] sm:$0xff] }
  0xf5   :  { %965 = vmatpush.msrb.mxu1 %v1935_v28 }
  0xf6   :  { %923 = vmatpush.msra.mxu3 %v1798_v62  ;;  %737 = vmatpush.msra.mxu2 %v697_v57  ;;  %v695_v62 = vmax.f32 %v1422_v24, 0.0  ;;  %v1477_v57 = vld [vmem:[%s3180_s3 + $0x2b8] sm:$0xff]  ;;  %v1456_v24 = vld [vmem:[%s3180_s3 + $0x210] sm:$0xff] }
  0xf7   :  { %966 = vmatpush.msrb.mxu1 %v1953_v32 }
  0xf8   :  { %924 = vmatpush.msra.mxu3 %v1819_v2  ;;  %738 = vmatpush.msra.mxu2 %v695_v62  ;;  %v1473_v62 = vld [vmem:[%s3180_s3 + $0x298] sm:$0xff] }
  0xf9   :  { %967 = vmatpush.msrb.mxu1 %v1971_v37 }
  0xfa   :  { %925 = vmatpush.msra.mxu3 %v1837_v6  ;;  %v1478_v6 = vld [vmem:[%s3180_s3 + $0x2c0] sm:$0xff] }
  0xfb   :  { %968 = vmatpush.msrb.mxu1 %v1989_v42  ;;  %894 = vmatpush.msra.mxu0 %v1478_v6  ;;  %v1470_v42 = vld [vmem:[%s3180_s3 + $0x280] sm:$0xff] }
  0xfc   :  { %926 = vmatpush.msra.mxu3 %v1855_v10  ;;  %v1476_v10 = vld [vmem:[%s3180_s3 + $0x2b0] sm:$0xff]  ;;  %v1589_v6 = vld [vmem:[%s3178_s1] sm:$0x7] }
  0xfd   :  { %969 = vmatpush.msrb.mxu1 %v2007_v46  ;;  %895 = vmatpush.msra.mxu0 %v1476_v10  ;;  %v1450_v10 = vld [vmem:[%s3180_s3 + $0x1e0] sm:$0xff] }
  0xfe   :  { %927 = vmatpush.msra.mxu3 %v1873_v14 }
  0xff   :  { %1022 = vmatpush.msra.mxu1 %v2015_v48 }
 0x100   :  { %928 = vmatpush.msra.mxu3 %v1891_v18  ;;  %v1474_v18 = vld [vmem:[%s3180_s3 + $0x2a0] sm:$0xff] }
 0x101   :  { %1023 = vmatpush.msra.mxu1 %v2033_v52  ;;  %896 = vmatpush.msra.mxu0 %v1474_v18  ;;  %v819_v18 = vld [vmem:[%s3180_s3 + $0x1b0] sm:$0xff] }
 0x102   :  { %929 = vmatpush.msra.mxu3 %v1909_v22  ;;  %v1472_v22 = vld [vmem:[%s3180_s3 + $0x290] sm:$0xff] }
 0x103   :  { %1024 = vmatpush.msra.mxu1 %v2051_v59  ;;  %897 = vmatpush.msra.mxu0 %v1472_v22  ;;  %v1468_v59 = vld [vmem:[%s3180_s3 + $0x270] sm:$0xff]  ;;  %v817_v22 = vld [vmem:[%s3180_s3 + $0x1a0] sm:$0xff] }
 0x105   :  { %1025 = vmatpush.msra.mxu1 %v2069_v1  ;;  %898 = vmatpush.msra.mxu0 %v1470_v42  ;;  %v3278_v42 = vld [vmem:[#allocation6_spill] sm:$0xff] }
 0x107   :  { %1026 = vmatpush.msra.mxu1 %v2087_v9  ;;  %899 = vmatpush.msra.mxu0 %v1468_v59  ;;  %v1455_v59 = vld [vmem:[%s3180_s3 + $0x208] sm:$0xff] }
 0x109   :  { %1027 = vmatpush.msra.mxu1 %v2105_v17  ;;  %v1464_v17 = vld [vmem:[%s3180_s3 + $0x250] sm:$0xff]  ;;  %900 = vmatpush.msra.mxu0 %v1466_v13 }
 0x10a   :  { %v3283_v13 = vld [vmem:[#allocation23_spill] sm:$0xff] }
 0x10b   :  { %1028 = vmatpush.msra.mxu1 %v2123_v26  ;;  %v1462_v26 = vld [vmem:[%s3180_s3 + $0x240] sm:$0xff]  ;;  %901 = vmatpush.msra.mxu0 %v1464_v17 }
 0x10c   :  { %v3286_v17 = vld [vmem:[#allocation10_spill] sm:$0xff] }
 0x10d   :  { %1029 = vmatpush.msra.mxu1 %v2141_v34  ;;  %v1460_v34 = vld [vmem:[%s3180_s3 + $0x230] sm:$0xff]  ;;  %902 = vmatpush.msra.mxu0 %v1462_v26 }
 0x10e   :  { %v3287_v26 = vld [vmem:[#allocation27_spill] sm:$0xff] }
 0x10f   :  { %1030 = vmatpush.msra.mxu1 %v2159_v44  ;;  %903 = vmatpush.msra.mxu0 %v1460_v34  ;;  %v3291_v34 = vld [vmem:[#allocation31_spill] sm:$0xff] }
 0x111   :  { %1031 = vmatpush.msra.mxu1 %v2169_v50  ;;  %904 = vmatpush.msra.mxu0 %v1458_v20  ;;  %v3293_v20 = vld [vmem:[#allocation33_spill] sm:$0xff] }
 0x113   :  { %1032 = vmatpush.msra.mxu1 %v2179_v55  ;;  %v1475_v55 = vld [vmem:[%s3180_s3 + $0x2a8] sm:$0xff]  ;;  %905 = vmatpush.msra.mxu0 %v1456_v24 }
 0x114   :  { %v814_v24 = vld [vmem:[%s3180_s3 + $0x188] sm:$0xff] }
 0x115   :  { %1033 = vmatpush.msra.mxu1 %v2188_v61 }
 0x117   :  { %1034 = vmatpush.msra.mxu1 %v2198_v3 }
 0x119   :  { %1035 = vmatpush.msra.mxu1 %v2215_v19 }
 0x11b   :  { %v344_v51 = vpop.f32.mrf.mxu0  ;;  %v364_v60 = vpop.f32.mrf.mxu1  ;;  %1036 = vmatpush.msra.mxu1 %v2233_v36  ;;  %v1465_v36 = vld [vmem:[%s3180_s3 + $0x258] sm:$0xff] }
 0x11c   :  { %v365_v37 = vadd.f32 %v364_v60, %v344_v51  ;;  %v1454_v60 = vld [vmem:[%s3180_s3 + $0x200] sm:$0xff] }
 0x11d   :  { %906 = vmatpush.msra.mxu0 %v1454_v60  ;;  %1037 = vmatpush.msra.mxu1 %v2251_v56  ;;  %v1463_v56 = vld [vmem:[%s3180_s3 + $0x248] sm:$0xff]  ;;  %v3297_v60 = vld [vmem:[#allocation37_spill] sm:$0xff] }
 0x120   :  { %v304_v2 = vpop.f32.mrf.mxu2  ;;  %v324_v28 = vpop.f32.mrf.mxu3 }
 0x121   :  { %v325_v1 = vadd.f32 %v324_v28, %v304_v2  ;;  %v1471_v2 = vld [vmem:[%s3180_s3 + $0x288] sm:$0xff]  ;;  %v1452_v28 = vld [vmem:[%s3180_s3 + $0x1f0] sm:$0xff] }
 0x122   :  { %907 = vmatpush.msra.mxu0 %v1452_v28  ;;  %v3301_v28 = vld [vmem:[#allocation22_spill] sm:$0xff] }
 0x124   :  { %908 = vmatpush.msra.mxu0 %v1450_v10  ;;  %v3305_v10 = vld [vmem:[#allocation30_spill] sm:$0xff] }
 0x125   :  { %v432_v14 = vpop.f32.mrf.mxu1  ;;  %v452_v32 = vpop.f32.mrf.mxu0 }
 0x126   :  { %v433_v46 = vadd.f32 %v432_v14, %v365_v37  ;;  %v3277_v37 = vld [vmem:[#allocation17_spill] sm:$0xff] }
 0x128   :  { %v453_v9 = vadd.f32 %v452_v32, %v433_v46  ;;  %v1448_v32 = vld [vmem:[%s3180_s3 + $0x1d0] sm:$0xff] }
 0x129   :  { %909 = vmatpush.msra.mxu0 %v1448_v32  ;;  %v3279_v46 = vld [vmem:[#allocation19_spill] sm:$0xff]  ;;  %v3308_v32 = vld [vmem:[#allocation36_spill] sm:$0xff] }
 0x12a   :  { %v392_v48 = vpop.f32.mrf.mxu3  ;;  %v412_v52 = vpop.f32.mrf.mxu2 }
 0x12b   :  { %v393_v0 = vadd.f32 %v392_v48, %v325_v1  ;;  %v3280_v48 = vld [vmem:[#allocation7_spill] sm:$0xff]  ;;  %v3281_v1 = vld [vmem:[#allocation21_spill] sm:$0xff] }
 0x12d   :  { %v413_v12 = vadd.f32 %v412_v52, %v393_v0  ;;  %v813_v52 = vld [vmem:[%s3180_s3 + $0x180] sm:$0xff] }
 0x12e   :  { %v3285_v0 = vld [vmem:[#allocation25_spill] sm:$0xff] }
 0x138   :  { %v602_v40 = vpop.f32.mrf.mxu1 }
 0x13e   :  { %v562_v35 = vpop.f32.mrf.mxu3 }
 0x13f   :  { %v582_v23 = vpop.f32.mrf.mxu0 }
 0x140   :  { %v603_v5 = vadd.f32 %v602_v40, %v582_v23  ;;  %v3282_v40 = vld [vmem:[#allocation8_spill] sm:$0xff] }
 0x141   :  { %v1453_v23 = vld [vmem:[%s3180_s3 + $0x1f8] sm:$0xff] }
 0x142   :  { %v606_v4 = vadd.f32 %v603_v5, %v453_v9  ;;  %v3284_v9 = vld [vmem:[#allocation9_spill] sm:$0xff]  ;;  %v1451_v5 = vld [vmem:[%s3180_s3 + $0x1e8] sm:$0xff] }
 0x144   :  { %v609_v8 = vadd.f32 %v2794_v21, %v606_v4  ;;  %v542_v41 = vpop.f32.mrf.mxu2  ;;  %v1449_v4 = vld [vmem:[%s3180_s3 + $0x1d8] sm:$0xff] }
 0x145   :  { %v563_v47 = vadd.f32 %v562_v35, %v542_v41  ;;  %v3288_v35 = vld [vmem:[#allocation11_spill] sm:$0xff]  ;;  %v3289_v41 = vld [vmem:[#allocation29_spill] sm:$0xff] }
 0x146   :  { %v611_v16 = vmax.f32 %v609_v8, 0.0  ;;  %v822_v8 = vld [vmem:[%s3180_s3 + $0x1c8] sm:$0x1] }
 0x147   :  { %v605_v44 = vadd.f32 %v563_v47, %v413_v12  ;;  %v3290_v12 = vld [vmem:[#allocation12_spill] sm:$0xff] }
 0x148   :  { %1421 = vmatmul.msk.f32.vlgmr.msrb.gmra.mxu2 %vm612_vm3, %v611_v16  ;;  %v820_v47 = vld [vmem:[%s3180_s3 + $0x1b8] sm:$0xff] }
 0x149   :  { %v608_v50 = vadd.f32 %v2794_v21, %v605_v44  ;;  %934 = vmatpush.msrb.mxu2 %v1479_v53  ;;  %v3292_v16 = vld [vmem:[#allocation13_spill] sm:$0xff]  ;;  %v818_v53 = vld [vmem:[%s3180_s3 + $0x1a8] sm:$0xff] }
 0x14a   :  { %v1570_v44 = vld [vmem:[%s3180_s3 + $0x560] sm:$0x1] }
 0x14b   :  { %v610_v51 = vmax.f32 %v608_v50, 0.0  ;;  %935 = vmatpush.msrb.mxu2 %v1477_v57  ;;  %v3294_v57 = vld [vmem:[#allocation14_spill] sm:$0xff]  ;;  %v816_v50 = vld [vmem:[%s3180_s3 + $0x198] sm:$0xff] }
 0x14d   :  { %635 = vmatmul.f32.vlgmr.msrb.gmra.mxu3 %v610_v51  ;;  %936 = vmatpush.msrb.mxu2 %v1475_v55  ;;  %v3295_v55 = vld [vmem:[#allocation35_spill] sm:$0xff] }
 0x14e   :  { %v760_v61 = vpop.f32.mrf.mxu1  ;;  %982 = vmatpush.msrb.mxu3 %v1924_v25  ;;  %v1469_v25 = vld [vmem:[%s3180_s3 + $0x278] sm:$0xff]  ;;  %v3296_v51 = vld [vmem:[#allocation15_spill] sm:$0xff] }
 0x14f   :  { %v761_v3 = vadd.f32 %v760_v61, %v2258_v7  ;;  %937 = vmatpush.msrb.mxu2 %v1473_v62  ;;  %v3298_v62 = vld [vmem:[#allocation16_spill] sm:$0xff]  ;;  %v3299_v61 = vld [vmem:[#allocation18_spill] sm:$0xff] }
 0x150   :  { %1445 = vmatmul.msk.f32.vlgmr.msra.gmra.mxu2 %vm103_vm1, %v1589_v6  ;;  %983 = vmatpush.msrb.mxu3 %v1942_v29  ;;  %v1467_v29 = vld [vmem:[%s3180_s3 + $0x268] sm:$0xff] }
 0x151   :  { %v2855_v14 = vmax.f32 %v761_v3, 0.0  ;;  %938 = vmatpush.msrb.mxu2 %v1471_v2  ;;  %v3300_v2 = vld [vmem:[#allocation20_spill] sm:$0xff]  ;;  %v3303_v6 = vld [vmem:[#allocation26_spill] sm:$0xff] }
 0x152   :  { %984 = vmatpush.msrb.mxu3 %v1960_v33  ;;  %v1571_v33 = vld [vmem:[%s3180_s3 + $0x568] sm:$0x1]  ;;  %v3302_v3 = vld [vmem:[#allocation24_spill] sm:$0xff] }
 0x153   :  { %v884_v19 = vrot.slane %v2855_v14, 1  ;;  %939 = vmatpush.msrb.mxu2 %v1469_v25  ;;  %v3304_v25 = vld [vmem:[#allocation28_spill] sm:$0xff] }
 0x154   :  { %985 = vmatpush.msrb.mxu3 %v1978_v38  ;;  %v821_v38 = vld [vmem:[%s3180_s3 + $0x1c0] sm:$0x1] }
 0x155   :  { %1509 = vmatmul.msk.f32.vlgmr.msrb.gmra.mxu1 %vm278_vm2, %v884_v19  ;;  %1507 = vmatmul.msk.f32.vlgmr.msra.gmra.mxu3 %vm278_vm2, %v884_v19  ;;  %v3306_v19 = vld [vmem:[#allocation32_spill] sm:$0xff] }
 0x156   :  { %940 = vmatpush.msrb.mxu2 %v1467_v29  ;;  %986 = vmatpush.msrb.mxu3 %v1996_v43  ;;  %v1461_v43 = vld [vmem:[%s3180_s3 + $0x238] sm:$0xff]  ;;  %v3307_v29 = vld [vmem:[#allocation34_spill] sm:$0xff] }
 0x157   :  { %1574 = vmatpush.msk.msrb.mxu1 %vm107_vm0, %v1571_v33  ;;  %1510 = vmatpush.msk.msrb.mxu0 %vm107_vm0, %v821_v38  ;;  %v811_v33 = vld [vmem:[%s3180_s3 + $0x170] sm:$0xff]  ;;  %v809_v38 = vld [vmem:[%s3180_s3 + $0x160] sm:$0xff] }
 0x158   :  { %941 = vmatpush.msrb.mxu2 %v1465_v36  ;;  %987 = vmatpush.msrb.mxu3 %v2020_v49  ;;  %v1459_v49 = vld [vmem:[%s3180_s3 + $0x228] sm:$0xff]  ;;  %v812_v36 = vld [vmem:[%s3180_s3 + $0x178] sm:$0xff] }
 0x159   :  { %1195 = vmatpush.msrb.mxu1 %v2297_v45  ;;  %1006 = vmatpush.msrb.mxu0 %v819_v18  ;;  %v815_v45 = vld [vmem:[%s3180_s3 + $0x190] sm:$0xff] }
 0x15a   :  { %942 = vmatpush.msrb.mxu2 %v1463_v56  ;;  %988 = vmatpush.msrb.mxu3 %v2038_v54  ;;  %v1457_v54 = vld [vmem:[%s3180_s3 + $0x218] sm:$0xff]  ;;  %v810_v56 = vld [vmem:[%s3180_s3 + $0x168] sm:$0xff]  ;;  %v807_v18 = vld [vmem:[%s3180_s3 + $0x150] sm:$0xff] }
 0x15b   :  { %1196 = vmatpush.msrb.mxu1 %v3277_v37  ;;  %1007 = vmatpush.msrb.mxu0 %v817_v22  ;;  %v805_v22 = vld [vmem:[%s3180_s3 + $0x140] sm:$0xff]  ;;  %v803_v37 = vld [vmem:[%s3180_s3 + $0x130] sm:$0xff] }
 0x15c   :  { %943 = vmatpush.msrb.mxu2 %v1461_v43  ;;  %989 = vmatpush.msrb.mxu3 %v3278_v42  ;;  %v808_v43 = vld [vmem:[%s3180_s3 + $0x158] sm:$0xff] }
 0x15d   :  { %1197 = vmatpush.msrb.mxu1 %v3279_v46  ;;  %1008 = vmatpush.msrb.mxu0 %v815_v45  ;;  %v804_v42 = vld [vmem:[%s3180_s3 + $0x138] sm:$0xff]  ;;  %v801_v45 = vld [vmem:[%s3180_s3 + $0x120] sm:$0xff]  ;;  %v799_v46 = vld [vmem:[%s3180_s3 + $0x110] sm:$0xff] }
 0x15e   :  { %944 = vmatpush.msrb.mxu2 %v1459_v49  ;;  %990 = vmatpush.msrb.mxu3 %v3280_v48  ;;  %v806_v49 = vld [vmem:[%s3180_s3 + $0x148] sm:$0xff]  ;;  %v800_v48 = vld [vmem:[%s3180_s3 + $0x118] sm:$0xff] }
 0x15f   :  { %1198 = vmatpush.msrb.mxu1 %v3281_v1  ;;  %1009 = vmatpush.msrb.mxu0 %v813_v52  ;;  %v797_v52 = vld [vmem:[%s3180_s3 + $0x100] sm:$0xff] }
 0x160   :  { %945 = vmatpush.msrb.mxu2 %v1457_v54  ;;  %991 = vmatpush.msrb.mxu3 %v3282_v40  ;;  %v802_v54 = vld [vmem:[%s3180_s3 + $0x128] sm:$0xff]  ;;  %v3024_v40 = vld [vmem:[%s3183_s6] sm:$0x1] }
 0x161   :  { %1199 = vmatpush.msrb.mxu1 %v3283_v13  ;;  %1010 = vmatpush.msrb.mxu0 %v811_v33  ;;  %v1514_v33 = vld [vmem:[%s3180_s3 + $0x3a0] sm:$0xff] }
 0x162   :  { %946 = vmatpush.msrb.mxu2 %v1455_v59  ;;  %992 = vmatpush.msrb.mxu3 %v3284_v9  ;;  %v798_v59 = vld [vmem:[%s3180_s3 + $0x108] sm:$0xff] }
 0x163   :  { %1200 = vmatpush.msrb.mxu1 %v3285_v0  ;;  %1011 = vmatpush.msrb.mxu0 %v809_v38  ;;  %v3314_v38 = vld [vmem:[#allocation47_spill] sm:$0xff] }
 0x164   :  { %947 = vmatpush.msrb.mxu2 %v1453_v23  ;;  %993 = vmatpush.msrb.mxu3 %v3286_v17 }
 0x165   :  { %1201 = vmatpush.msrb.mxu1 %v3287_v26  ;;  %1012 = vmatpush.msrb.mxu0 %v807_v18  ;;  %v3315_v18 = vld [vmem:[#allocation49_spill] sm:$0xff] }
 0x166   :  { %948 = vmatpush.msrb.mxu2 %v1451_v5  ;;  %994 = vmatpush.msrb.mxu3 %v3288_v35  ;;  %v1544_v35 = vld [vmem:[%s3180_s3 + $0x490] sm:$0xff] }
 0x167   :  { %1202 = vmatpush.msrb.mxu1 %v3289_v41  ;;  %1013 = vmatpush.msrb.mxu0 %v805_v22  ;;  %v1543_v41 = vld [vmem:[%s3180_s3 + $0x488] sm:$0xff] }
 0x168   :  { %949 = vmatpush.msrb.mxu2 %v1449_v4  ;;  %995 = vmatpush.msrb.mxu3 %v3290_v12  ;;  %v1540_v12 = vld [vmem:[%s3180_s3 + $0x470] sm:$0xff]  ;;  %v3317_v22 = vld [vmem:[#allocation50_spill] sm:$0xff] }
 0x169   :  { %1203 = vmatpush.msrb.mxu1 %v3291_v34  ;;  %1014 = vmatpush.msrb.mxu0 %v803_v37  ;;  %v1538_v34 = vld [vmem:[%s3180_s3 + $0x460] sm:$0xff]  ;;  %v3319_v37 = vld [vmem:[#allocation44_spill] sm:$0xff] }
 0x16a   :  { %1512 = vmatpush.msk.msra.mxu2 %vm107_vm0, %v822_v8  ;;  %996 = vmatpush.msrb.mxu3 %v3292_v16  ;;  %v1542_v8 = vld [vmem:[%s3180_s3 + $0x480] sm:$0xff]  ;;  %v1539_v16 = vld [vmem:[%s3180_s3 + $0x468] sm:$0xff] }
 0x16b   :  { %1204 = vmatpush.msrb.mxu1 %v3293_v20  ;;  %1015 = vmatpush.msrb.mxu0 %v801_v45  ;;  %v1532_v20 = vld [vmem:[%s3180_s3 + $0x430] sm:$0xff] }
 0x16c   :  { %1046 = vmatpush.msra.mxu2 %v820_v47  ;;  %997 = vmatpush.msrb.mxu3 %v3294_v57  ;;  %v1121_v47 = vrot.slane %v2855_v14, 2  ;;  %v1533_v57 = vld [vmem:[%s3180_s3 + $0x438] sm:$0xff] }
 0x16d   :  { %1205 = vmatpush.msrb.mxu1 %v3295_v55  ;;  %1016 = vmatpush.msrb.mxu0 %v799_v46  ;;  %v1526_v55 = vld [vmem:[%s3180_s3 + $0x400] sm:$0xff]  ;;  %v3321_v45 = vld [vmem:[#allocation48_spill] sm:$0xff] }
 0x16e   :  { %1047 = vmatpush.msra.mxu2 %v818_v53  ;;  %1572 = vmatpush.msk.msra.mxu3 %vm107_vm0, %v1570_v44  ;;  %v1537_v53 = vld [vmem:[%s3180_s3 + $0x458] sm:$0xff]  ;;  %v1535_v44 = vld [vmem:[%s3180_s3 + $0x448] sm:$0xff] }
 0x16f   :  { %1206 = vmatpush.msrb.mxu1 %v3297_v60  ;;  %1017 = vmatpush.msrb.mxu0 %v797_v52  ;;  %v3309_v60 = vld [vmem:[#allocation38_spill] sm:$0xff] }
 0x170   :  { %1048 = vmatpush.msra.mxu2 %v816_v50  ;;  %1155 = vmatpush.msra.mxu3 %v3296_v51  ;;  %v1531_v50 = vld [vmem:[%s3180_s3 + $0x428] sm:$0xff]  ;;  %v1524_v51 = vld [vmem:[%s3180_s3 + $0x3f0] sm:$0xff] }
 0x172   :  { %1049 = vmatpush.msra.mxu2 %v814_v24  ;;  %1156 = vmatpush.msra.mxu3 %v3298_v62  ;;  %v1528_v24 = vld [vmem:[%s3180_s3 + $0x410] sm:$0xff]  ;;  %v1522_v62 = vld [vmem:[%s3180_s3 + $0x3e0] sm:$0xff] }
 0x174   :  { %1157 = vmatpush.msra.mxu3 %v3299_v61  ;;  %1050 = vmatpush.msra.mxu2 %v812_v36  ;;  %v3310_v61 = vld [vmem:[#allocation39_spill] sm:$0xff] }
 0x175   :  { %v1515_v36 = vld [vmem:[%s3180_s3 + $0x3a8] sm:$0xff] }
 0x176   :  { %1158 = vmatpush.msra.mxu3 %v3300_v2  ;;  %1051 = vmatpush.msra.mxu2 %v810_v56  ;;  %v1520_v2 = vld [vmem:[%s3180_s3 + $0x3d0] sm:$0xff] }
 0x178   :  { %1159 = vmatpush.msra.mxu3 %v3301_v28  ;;  %1052 = vmatpush.msra.mxu2 %v808_v43  ;;  %v1521_v28 = vld [vmem:[%s3180_s3 + $0x3d8] sm:$0xff] }
 0x179   :  { %v3316_v43 = vld [vmem:[#allocation41_spill] sm:$0xff] }
 0x17a   :  { %1160 = vmatpush.msra.mxu3 %v3302_v3  ;;  %1053 = vmatpush.msra.mxu2 %v806_v49  ;;  %v3311_v3 = vld [vmem:[#allocation40_spill] sm:$0xff]  ;;  %v3318_v49 = vld [vmem:[#allocation42_spill] sm:$0xff] }
 0x17c   :  { %1161 = vmatpush.msra.mxu3 %v3303_v6  ;;  %1054 = vmatpush.msra.mxu2 %v804_v42  ;;  %v1518_v6 = vld [vmem:[%s3180_s3 + $0x3c0] sm:$0xff] }
 0x17d   :  { %v3320_v42 = vld [vmem:[#allocation46_spill] sm:$0xff] }
 0x17e   :  { %1162 = vmatpush.msra.mxu3 %v3304_v25  ;;  %1055 = vmatpush.msra.mxu2 %v802_v54  ;;  %v1519_v25 = vld [vmem:[%s3180_s3 + $0x3c8] sm:$0xff] }
 0x17f   :  { %v3322_v54 = vld [vmem:[#allocation51_spill] sm:$0xff] }
 0x180   :  { %1163 = vmatpush.msra.mxu3 %v3305_v10  ;;  %1056 = vmatpush.msra.mxu2 %v800_v48  ;;  %v3312_v10 = vld [vmem:[#allocation43_spill] sm:$0xff] }
 0x182   :  { %1164 = vmatpush.msra.mxu3 %v3306_v19  ;;  %1057 = vmatpush.msra.mxu2 %v798_v59  ;;  %v1516_v19 = vld [vmem:[%s3180_s3 + $0x3b0] sm:$0xff] }
 0x184   :  { %1165 = vmatpush.msra.mxu3 %v3307_v29  ;;  %v1517_v29 = vld [vmem:[%s3180_s3 + $0x3b8] sm:$0xff] }
 0x186   :  { %1166 = vmatpush.msra.mxu3 %v3308_v32  ;;  %v3313_v32 = vld [vmem:[#allocation45_spill] sm:$0xff] }
 0x1cb   :  { %v656_v1 = vpop.f32.mrf.mxu2 }
 0x1d0   :  { %v636_v23 = vpop.f32.mrf.mxu3 }
 0x1d1   :  { %v637_v13 = vadd.f32 %v636_v23, %v3024_v40 }
 0x1d2   :  { %v971_v52 = vpop.f32.mrf.mxu1 }
 0x1d3   :  { %v740_v9 = vpop.f32.mrf.mxu2  ;;  %v3027_v5 = vadd.f32 %v656_v1, %v637_v13 }
 0x1d4   :  { %v741_v0 = vadd.f32 %v740_v9, %v2258_v7  ;;  %v1545_v7 = vld [vmem:[%s3180_s3 + $0x498] sm:$0xff] }
 0x1d5   :  { %v660_v17 = vsel %vm659_vm4, %v3027_v5, -inf }
 0x1d6   :  { %v3032_v4 = vmax.f32 %v741_v0, 0.0  ;;  %661 = vmax.xlane.f32.xlu0 %v660_v17 }
 0x1d8   :  { %998 = vmatmul.f32.vlgmr.msrb.gmra.mxu3 %v3032_v4  ;;  %1038 = vmatmul.f32.vlgmr.msra.gmra.mxu1 %v3032_v4  ;;  %v883_v26 = vrot.slane %v3032_v4, 1  ;;  %v1120_v56 = vrot.slane %v3032_v4, 2  ;;  %v931_v46 = vpop.f32.mrf.mxu3 }
 0x1d9   :  { %1220 = vmatpush.msrb.mxu3 %v2525_v11  ;;  %v1541_v11 = vld [vmem:[%s3180_s3 + $0x478] sm:$0xff] }
 0x1da   :  { %910 = vmatmul.f32.vlgmr.msra.gmra.mxu0 %v883_v26  ;;  %950 = vmatmul.f32.vlgmr.msrb.gmra.mxu2 %v883_v26 }
 0x1db   :  { %1131 = vmatpush.msra.mxu0 %v1544_v35  ;;  %1171 = vmatpush.msrb.mxu2 %v1545_v7 }
 0x1dc   :  { %1221 = vmatpush.msrb.mxu3 %v2573_v15  ;;  %v1536_v15 = vld [vmem:[%s3180_s3 + $0x450] sm:$0xff] }
 0x1dd   :  { %1132 = vmatpush.msra.mxu0 %v1542_v8  ;;  %1172 = vmatpush.msrb.mxu2 %v1543_v41 }
 0x1de   :  { %1222 = vmatpush.msrb.mxu3 %v2578_v63  ;;  %v1534_v63 = vld [vmem:[%s3180_s3 + $0x440] sm:$0xff] }
 0x1df   :  { %1133 = vmatpush.msra.mxu0 %v1540_v12  ;;  %1173 = vmatpush.msrb.mxu2 %v1541_v11 }
 0x1e0   :  { %1573 = vmatmul.msk.f32.vlgmr.msra.gmra.mxu3 %vm278_vm2, %v1121_v47  ;;  %1575 = vmatmul.msk.f32.vlgmr.msrb.gmra.mxu1 %vm278_vm2, %v1121_v47 }
 0x1e1   :  { %1134 = vmatpush.msra.mxu0 %v1538_v34  ;;  %1174 = vmatpush.msrb.mxu2 %v1539_v16 }
 0x1e2   :  { %1511 = vmatmul.msk.f32.vlgmr.msrb.gmra.mxu0 %vm278_vm2, %v2855_v14  ;;  %1513 = vmatmul.msk.f32.vlgmr.msra.gmra.mxu2 %vm278_vm2, %v2855_v14  ;;  %v1530_v14 = vld [vmem:[%s3180_s3 + $0x420] sm:$0xff] }
 0x1e3   :  { %1135 = vmatpush.msra.mxu0 %v1536_v15  ;;  %1175 = vmatpush.msrb.mxu2 %v1537_v53 }
 0x1e4   :  { %1223 = vmatpush.msrb.mxu3 %v2584_v31  ;;  %v1529_v31 = vld [vmem:[%s3180_s3 + $0x418] sm:$0xff] }
 0x1e5   :  { %1136 = vmatpush.msra.mxu0 %v1534_v63  ;;  %1176 = vmatpush.msrb.mxu2 %v1535_v44 }
 0x1e6   :  { %1224 = vmatpush.msrb.mxu3 %v2591_v58  ;;  %v1527_v58 = vld [vmem:[%s3180_s3 + $0x408] sm:$0xff] }
 0x1e7   :  { %1137 = vmatpush.msra.mxu0 %v1532_v20  ;;  %1177 = vmatpush.msrb.mxu2 %v1533_v57 }
 0x1e8   :  { %1225 = vmatpush.msrb.mxu3 %v2597_v30  ;;  %v1525_v30 = vld [vmem:[%s3180_s3 + $0x3f8] sm:$0xff] }
 0x1e9   :  { %1138 = vmatpush.msra.mxu0 %v1530_v14  ;;  %1178 = vmatpush.msrb.mxu2 %v1531_v50 }
 0x1ea   :  { %1226 = vmatpush.msrb.mxu3 %v2603_v27  ;;  %v1523_v27 = vld [vmem:[%s3180_s3 + $0x3e8] sm:$0xff]  ;;  %s1617_s3 = smov [#allocation3]  }
 0x1eb   :  { %1139 = vmatpush.msra.mxu0 %v1528_v24  ;;  %1179 = vmatpush.msrb.mxu2 %v1529_v31  ;;  %s1277_s25 = sshll.u32 %s1617_s3, 4  ;;  %s1278_s25 = int_to_ptr.vmem [resolvable:$true] %s1277_s25 }
 0x1ec   :  { %1227 = vmatpush.msrb.mxu3 %v3309_v60 }
 0x1ed   :  { %1140 = vmatpush.msra.mxu0 %v1526_v55  ;;  %1180 = vmatpush.msrb.mxu2 %v1527_v58 }
 0x1ee   :  { %1228 = vmatpush.msrb.mxu3 %v3310_v61 }
 0x1ef   :  { %1141 = vmatpush.msra.mxu0 %v1524_v51  ;;  %1181 = vmatpush.msrb.mxu2 %v1525_v30 }
 0x1f0   :  { %1229 = vmatpush.msrb.mxu3 %v3311_v3 }
 0x1f1   :  { %1142 = vmatpush.msra.mxu0 %v1522_v62  ;;  %1182 = vmatpush.msrb.mxu2 %v1523_v27 }
 0x1f2   :  { %1230 = vmatpush.msrb.mxu3 %v3312_v10 }
 0x1f3   :  { %1143 = vmatpush.msra.mxu0 %v1520_v2  ;;  %1183 = vmatpush.msrb.mxu2 %v1521_v28 }
 0x1f4   :  { %1231 = vmatpush.msrb.mxu3 %v3313_v32 }
 0x1f5   :  { %1144 = vmatpush.msra.mxu0 %v1518_v6  ;;  %1184 = vmatpush.msrb.mxu2 %v1519_v25 }
 0x1f6   :  { %1232 = vmatpush.msrb.mxu3 %v3314_v38 }
 0x1f7   :  { %1145 = vmatpush.msra.mxu0 %v1516_v19  ;;  %1185 = vmatpush.msrb.mxu2 %v1517_v29 }
 0x1f8   :  { %1233 = vmatpush.msrb.mxu3 %v3315_v18 }
 0x1f9   :  { %1146 = vmatpush.msra.mxu0 %v1514_v33  ;;  %1186 = vmatpush.msrb.mxu2 %v1515_v36 }
 0x1fa   :  { %1147 = vmatmul.f32.vlgmr.msra.gmra.mxu0 %v1120_v56  ;;  %1187 = vmatmul.f32.vlgmr.msrb.gmra.mxu2 %v1120_v56 }
 0x1fb   :  { %1576 = vmatpush.msk.msrb.mxu0 %vm107_vm0, %v3316_v43  ;;  %1234 = vmatpush.msrb.mxu3 %v3317_v22 }
 0x1fd   :  { %1251 = vmatpush.msrb.mxu0 %v3318_v49  ;;  %1235 = vmatpush.msrb.mxu3 %v2696_v39 }
 0x1ff   :  { %1252 = vmatpush.msrb.mxu0 %v3319_v37 }
 0x201   :  { %1253 = vmatpush.msrb.mxu0 %v3320_v42 }
 0x203   :  { %1254 = vmatpush.msrb.mxu0 %v3321_v45 }
 0x205   :  { %1255 = vmatpush.msrb.mxu0 %v3322_v54 }
 0x249   :  { %v662_v20 = vpop.xlane.xlu0 %661 }
 0x24a   :  { %v663_v57 = vsub.f32 %v3027_v5, %v662_v20 }
 0x24c   :  { %v664_v14 = vmul.f32 1.442695, %v663_v57 }
 0x24e   :  { %1581 = vpow2.f32 %v664_v14 }
 0x254   :  { %v1582_v51 = vpop.eup %1581 }
 0x255   :  { %v1039_v13 = vpop.f32.mrf.mxu1  ;;  %v666_v30 = vsel %vm659_vm4, %v1582_v51, 0.0 }
 0x257   :  { %v911_v48 = vpop.f32.mrf.mxu0 }
 0x258   :  { %v932_v9 = vadd.f32 %v931_v46, %v911_v48 }
 0x25b   :  { %v999_v1 = vpop.f32.mrf.mxu3 }
 0x25c   :  { %v1000_v17 = vadd.f32 %v999_v1, %v932_v9 }
 0x25d   :  { %v951_v59 = vpop.f32.mrf.mxu2  ;;  %v1208_v11 = vpop.f32.mrf.mxu1 }
 0x25e   :  { %v972_v26 = vadd.f32 %v971_v52, %v951_v59 }
 0x25f   :  { %v1019_v23 = vpop.f32.mrf.mxu0 }
 0x260   :  { %v1020_v35 = vadd.f32 %v1019_v23, %v1000_v17  ;;  %v1040_v41 = vadd.f32 %v1039_v13, %v972_v26 }
 0x263   :  { %v1168_v4 = vpop.f32.mrf.mxu3 }
 0x265   :  { %v1059_v0 = vpop.f32.mrf.mxu2 }
 0x266   :  { %v1060_v34 = vadd.f32 %v1059_v0, %v1040_v41 }
 0x277   :  { %v1148_v39 = vpop.f32.mrf.mxu0 }
 0x278   :  { %v1169_v7 = vadd.f32 %v1168_v4, %v1148_v39 }
 0x27a   :  { %v1211_v8 = vadd.f32 %v1169_v7, %v1020_v35 }
 0x27c   :  { %v1213_v12 = vadd.f32 %v1211_v8, %v2794_v21 }
 0x27d   :  { %v1188_v47 = vpop.f32.mrf.mxu2 }
 0x27e   :  { %v1215_v16 = vmax.f32 %v1213_v12, 0.0  ;;  %v1209_v15 = vadd.f32 %v1208_v11, %v1188_v47 }
 0x280   :  { %v1212_v53 = vadd.f32 %v1209_v15, %v1060_v34  ;;  %1236 = vmatmul.f32.vlgmr.msrb.gmra.mxu3 %v1215_v16 }
 0x282   :  { %v1214_v63 = vadd.f32 %v1212_v53, %v2794_v21 }
 0x284   :  { %v1216_v44 = vmax.f32 %v1214_v63, 0.0 }
 0x286   :  { %1577 = vmatmul.msk.f32.vlgmr.msrb.gmra.mxu0 %vm612_vm3, %v1216_v44 }
 0x303   :  { %v1237_v50 = vpop.f32.mrf.mxu3  ;;  %v1257_v31 = vpop.f32.mrf.mxu0 }
 0x304   :  { %v1238_v24 = vadd.f32 %v1237_v50, %v3024_v40 }
 0x306   :  { %v1258_v55 = vadd.f32 %v1257_v31, %v1238_v24 }
 0x308   :  { %v1260_v58 = vsel %vm659_vm4, %v1258_v55, -inf }
 0x309   :  { %1261 = vmax.xlane.f32.xlu1 %v1260_v58 }
 0x311   :  { %667 = vadd.xlane.f32.xlu1 %v666_v30 }
 0x37c   :  { %v1262_v21 = vpop.xlane.xlu1 %1261 }
 0x37d   :  { %v1263_v60 = vsub.f32 %v1258_v55, %v1262_v21 }
 0x37f   :  { %v1264_v62 = vmul.f32 1.442695, %v1263_v60 }
 0x381   :  { %1583 = vpow2.f32 %v1264_v62 }
 0x384   :  { %v668_v27 = vpop.xlane.xlu1 %667 }
 0x385   :  { %1585 = vrcp.f32 %v668_v27 }
 0x387   :  { %v1584_v5 = vpop.eup %1583 }
 0x388   :  { %v1266_v61 = vsel %vm659_vm4, %v1584_v5, 0.0 }
 0x389   :  { %1267 = vadd.xlane.f32.xlu2 %v1266_v61 }
 0x38b   :  { %v1586_v40 = vpop.eup %1585 }
 0x38c   :  { %v670_v2 = vmul.f32 %v1586_v40, %v1582_v51 }
 0x38e   :  { %671 = vst.msk [vmem:[#allocation3] sm:$0x1] %vm659_vm4, %v670_v2 }
 0x3fc   :  { %v1268_v28 = vpop.xlane.xlu2 %1267 }
 0x3fd   :  { %1587 = vrcp.f32 %v1268_v28 }
 0x403   :  { %v1588_v3 = vpop.eup %1587 }
 0x404   :  { %v1270_v6 = vmul.f32 %v1588_v3, %v1584_v5 }
 0x406   :  { %1271 = vst.msk [vmem:[#allocation3 + $0x1] sm:$0x1] %vm659_vm4, %v1270_v6 }
 0x407   :  { %1282 = dma.vmem_to_hbm [thread:$0]  %s1278_s25, 32, %s1280_s27, [#allocation4]  }
 0x408   :  { %1614 = dma.done.wait [#allocation4], 32  }
 0x409   :  { %1615 = vsyncadd [#allocation4], 4294967264 }
 0x40a   :  { %1287 = vsyncpa [#allocation4], 1 }

</bundles_post_ra>
